<compile_context>
chip_gen: v6e
topology: v6e:2x2x1
jax: 0.10.0
libtpu: 0.0.40
codegen_flags: <defaults>
</compile_context>

<pallas_src>
import functools

import numpy as np

import jax
import jax.numpy as jnp
from jax.experimental import pallas as pl
from jax.experimental.pallas import tpu as pltpu


CFG = dict(
    vocab=32,
    emb_dim=32,                       # token_emb_dim
    n_ctx=16,                         # sequence length
    densenet_kernels=((3, 5), (3, 5)),
    densenet_first_num_filters=32,
    densenet_num_filters=32,
    densenet_last_num_filters=64,
    num_filters=32,                   # TextCNN filters
    kernel_sizes=(2, 3),              # TextCNN kernel sizes
    label_size=4,
)

LN_EPS = 1e-5


def _vmem():
    return pl.BlockSpec(memory_space=pltpu.MemorySpace.VMEM)


def _round_up(x, m):
    return (x + m - 1) // m * m


# ---------------------------------------------------------------------------
# Static layout of the two packed parameter slabs (pure Python, no arrays).
# ---------------------------------------------------------------------------
def _layout(cfg):
    dn_ks = tuple(tuple(r) for r in cfg["densenet_kernels"])
    tc_ks = tuple(cfg["kernel_sizes"])
    # 'same' padding matches PyTorch Conv1d(padding=(k-1)//2) only for odd k.
    assert all(k % 2 == 1 for row in dn_ks for k in row), (
        "even DenseNet kernel sizes change PyTorch's output length; unsupported")

    E = cfg["emb_dim"]
    width = len(dn_ks[0])
    first = cfg["densenet_first_num_filters"]
    numf = cfg["densenet_num_filters"]
    last = cfg["densenet_last_num_filters"]
    nf = cfg["num_filters"]
    L = cfg["label_size"]
    tdim = len(tc_ks) * nf
    ncol = max(width * first, width * numf, last, tdim, L)

    off = 0
    dn = []
    for i, kss in enumerate(dn_ks):
        cin = E if i == 0 else first + numf * (i - 1)
        in_width = 1 if i == 0 else width           # level 0 input is shared (emb)
        kmax = max(kss)
        rows = kmax * in_width * cin
        cout = first if i == 0 else numf
        dn.append(dict(off=off, rows=rows, kmax=kmax, cin=cin, cout=cout,
                       in_width=in_width, kss=kss))
        off += _round_up(rows, 16)                  # bf16 sublane-tile aligned

    cin_last = E + numf * width                     # PyTorch conv_last in_channels
    last_spec = dict(off=off, rows=cin_last, cout=last)
    off += _round_up(cin_last, 16)

    kmax_tc = max(tc_ks)
    tc_spec = dict(off=off, rows=kmax_tc * last, kmax=kmax_tc, nf=nf, kss=tc_ks)
    off += _round_up(kmax_tc * last, 16)

    fc_spec = dict(off=off, rows=tdim, L=L)
    off += _round_up(tdim, 16)

    return dict(dn_ks=dn_ks, tc_ks=tc_ks, E=E, width=width, ncol=ncol,
                dn=dn, last=last_spec, tc=tc_spec, fc=fc_spec,
                w_rows=off, p_rows=len(dn_ks) + 7)


# ---------------------------------------------------------------------------
# Fused forward kernel.  All intermediates live in VMEM / vregs.
# ---------------------------------------------------------------------------
def _fused_forward_kernel(x_ref, w_ref, p_ref, out_ref, *, B, T, lay):
    BT = B * T
    E = lay["E"]
    width = lay["width"]
    depth = len(lay["dn"])

    xin = x_ref[...]                               # (B*T, E+1) f32
    emb = xin[:, :E]                               # embeddings (pad rows are zero)
    mask = xin[:, E:E + 1]                         # token != 0

    row = jax.lax.broadcasted_iota(jnp.int32, (BT, 1), 0)
    tidx = (row & (T - 1)) if (T & (T - 1)) == 0 else (row % T)   # time per row

    def pvec(r, w):                                # one (1, w) f32 parameter row
        return p_ref[r:r + 1, :w]

    def mxu(a, r0, rows):                          # bf16 MXU dot, f32 accumulation
        assert a.shape[1] == rows
        return jnp.dot(a.astype(jnp.bfloat16), w_ref[r0:r0 + rows, :],
                       preferred_element_type=jnp.float32)

    def shifted_cols(h, shifts, edge_mask):
        # im2col along time via sublane rolls (XLU) on the flat (B*T, C) layout.
        # edge_mask zeroes rows whose source time index falls outside [0, T)
        # (== the reference conv's zero padding / cross-batch wrap).
        cols = []
        for s in shifts:
            if s == 0:
                cols.append(h)
                continue
            r = pltpu.roll(h, shift=(-s) % BT, axis=0)
            if edge_mask:
                valid = (tidx >= -s) if s < 0 else (tidx < T - s)
                r = jnp.where(valid, r, 0.0)
            cols.append(r)
        return cols[0] if len(cols) == 1 else jnp.concatenate(cols, axis=-1)

    def layer_norm(v, g_row, b_row):
        d = v.shape[-1]
        mu = jnp.mean(v, axis=-1, keepdims=True)
        c = v - mu
        var = jnp.mean(c * c, axis=-1, keepdims=True)
        return c * jax.lax.rsqrt(var + LN_EPS) * pvec(g_row, d) + pvec(b_row, d)

    # ---------------- DenseNet (all width branches fused per level) ----------
    hist = [[] for _ in range(width)]
    h = None
    for i, spec in enumerate(lay["dn"]):
        kmax, cout = spec["kmax"], spec["cout"]
        P = (kmax - 1) // 2
        if i == 0:
            src = emb
        elif i == 1:
            src = h                                # == [branch-0 hist | branch-1 hist]
        else:
            src = jnp.concatenate([c for j in range(width) for c in hist[j]],
                                  axis=-1)
        col = shifted_cols(src, tuple(range(-P, P + 1)), edge_mask=True)
        out_w = width * cout
        h = mxu(col, spec["off"], spec["rows"])[:, :out_w]
        h = jnp.maximum((h + pvec(i, out_w)) * mask, 0.0)
        if depth > 2 and i + 1 < depth:
            for j in range(width):
                hist[j].append(h[:, j * cout:(j + 1) * cout])

    # conv_last (K=1) over [embeddings | merge_0 | merge_1 | ...]
    ls = lay["last"]
    last_in = jnp.concatenate([emb, h], axis=-1)
    dense = mxu(last_in, ls["off"], ls["rows"])[:, :ls["cout"]]
    dense = jnp.maximum((dense + pvec(depth, ls["cout"])) * mask, 0.0)
    dense = layer_norm(dense, depth + 2, depth + 3)        # LayerNorm(densenet)

    # ---------------- TextCNN (both kernel sizes fused) ----------------------
    ts = lay["tc"]
    nf, tc_ks = ts["nf"], ts["kss"]
    tdim = len(tc_ks) * nf
    colc = shifted_cols(dense, tuple(range(ts["kmax"])), edge_mask=False)
    a = mxu(colc, ts["off"], ts["rows"])[:, :tdim]
    a = jnp.maximum(a + pvec(depth + 1, tdim), 0.0)
    # Zero the rows past each branch's 'valid' conv length before the time-max
    # (safe because ReLU output is >= 0 and the valid range is non-empty).
    lane = jax.lax.broadcasted_iota(jnp.int32, (1, tdim), 1)
    limit = jnp.zeros((1, tdim), jnp.int32)
    for j, k in enumerate(tc_ks):
        limit = jnp.where((lane >= j * nf) & (lane < (j + 1) * nf), T - k + 1, limit)
    a = jnp.where(tidx < limit, a, 0.0)
    pooled = jnp.max(a.reshape(B, T, tdim), axis=1)        # (B, tdim)
    feat = layer_norm(pooled, depth + 4, depth + 5)        # LayerNorm(textcnn)

    # ---------------- classifier + softmax -----------------------------------
    fs = lay["fc"]
    logits = mxu(feat, fs["off"], fs["rows"])[:, :fs["L"]] + pvec(depth + 6, fs["L"])
    m = jnp.max(logits, axis=-1, keepdims=True)
    e = jnp.exp(logits - m)
    out_ref[...] = e * pl.reciprocal(jnp.sum(e, axis=-1, keepdims=True), approx=True)


# ---------------------------------------------------------------------------
# Parameters, slab packing, wrapper
# ---------------------------------------------------------------------------
def init_params(key, cfg=CFG):
    ks = iter(jax.random.split(key, 64))
    nrm = lambda shape, s=0.1: jax.random.normal(next(ks), shape, jnp.float32) * s

    params = {}
    emb = nrm((cfg["vocab"], cfg["emb_dim"]))
    params["emb"] = emb.at[0].set(0.0)                     # padding_idx = 0

    first = cfg["densenet_first_num_filters"]
    numf = cfg["densenet_num_filters"]
    block = []
    for i, kss in enumerate(cfg["densenet_kernels"]):
        cin = cfg["emb_dim"] if i == 0 else first + numf * (i - 1)
        cout = first if i == 0 else numf
        block.append([(nrm((k, cin, cout)), nrm((1, cout), 0.01)) for k in kss])
    params["densenet"] = block

    width = len(cfg["densenet_kernels"][0])
    last = cfg["densenet_last_num_filters"]
    params["conv_last"] = (nrm((1, cfg["emb_dim"] + numf * width, last)),
                           nrm((1, last), 0.01))
    params["ln_densenet"] = (jnp.ones((last,), jnp.float32),
                             jnp.zeros((last,), jnp.float32))
    params["textcnn"] = [(nrm((k, last, cfg["num_filters"])),
                          nrm((1, cfg["num_filters"]), 0.01))
                         for k in cfg["kernel_sizes"]]
    tdim = len(cfg["kernel_sizes"]) * cfg["num_filters"]
    params["ln_textcnn"] = (jnp.ones((tdim,), jnp.float32),
                            jnp.zeros((tdim,), jnp.float32))
    params["fc"] = (nrm((tdim, cfg["label_size"])),
                    nrm((1, cfg["label_size"]), 0.01))
    return params


def pack_params(params, cfg=CFG):
    """Pack all weights into one bf16 slab and all bias/LN vectors into one f32 slab."""
    lay = _layout(cfg)
    ncol, width = lay["ncol"], lay["width"]

    w_slab = np.zeros((lay["w_rows"], ncol), np.float32)
    # DenseNet levels: width branches fused along output channels; levels > 0
    # are block-diagonal over the per-branch inputs.  Branch taps are centered
    # inside the level's max kernel (missing taps stay zero).
    for i, spec in enumerate(lay["dn"]):
        kmax, cin, cout, in_w = spec["kmax"], spec["cin"], spec["cout"], spec["in_width"]
        P = (kmax - 1) // 2
        for j, k in enumerate(spec["kss"]):
            w, _ = params["densenet"][i][j]                # (k, cin, cout)
            pj = (k - 1) // 2
            for t in range(k):
                kk = t + (P - pj)
                r0 = spec["off"] + kk * in_w * cin + (0 if in_w == 1 else j * cin)
                w_slab[r0:r0 + cin, j * cout:(j + 1) * cout] = np.asarray(w[t])

    ls = lay["last"]
    w_slab[ls["off"]:ls["off"] + ls["rows"], :ls["cout"]] = np.asarray(
        params["conv_last"][0][0])

    ts = lay["tc"]
    c_last = ls["cout"]
    for j, k in enumerate(ts["kss"]):
        w, _ = params["textcnn"][j]                        # (k, c_last, nf)
        for t in range(k):
            r0 = ts["off"] + t * c_last
            w_slab[r0:r0 + c_last, j * ts["nf"]:(j + 1) * ts["nf"]] = np.asarray(w[t])

    fs = lay["fc"]
    w_slab[fs["off"]:fs["off"] + fs["rows"], :fs["L"]] = np.asarray(params["fc"][0])

    # Bias / LayerNorm slab: one row per parameter vector, fixed order
    # [dn level 0..depth-1, conv_last, textcnn, gamma1, beta1, gamma2, beta2, fc].
    rows = []
    for i in range(len(lay["dn"])):
        rows.append(np.concatenate(
            [np.asarray(params["densenet"][i][j][1]).reshape(-1) for j in range(width)]))
    rows.append(np.asarray(params["conv_last"][1]).reshape(-1))
    rows.append(np.concatenate(
        [np.asarray(params["textcnn"][j][1]).reshape(-1) for j in range(len(ts["kss"]))]))
    g1, b1 = params["ln_densenet"]
    g2, b2 = params["ln_textcnn"]
    rows += [np.asarray(g1), np.asarray(b1), np.asarray(g2), np.asarray(b2),
             np.asarray(params["fc"][1]).reshape(-1)]
    p_slab = np.zeros((lay["p_rows"], ncol), np.float32)
    for r, vec in enumerate(rows):
        p_slab[r, :vec.shape[0]] = vec

    return dict(w=jnp.asarray(w_slab, jnp.bfloat16),
                p=jnp.asarray(p_slab, jnp.float32),
                emb=params["emb"])


def forward(packed, x, cfg=CFG):
    lay = _layout(cfg)
    B, T = x.shape

    # Tiny glue outside the kernel: embedding gather + mask column.
    ids = x.reshape(-1)
    emb_flat = jnp.take(packed["emb"], ids, axis=0)                 # (B*T, E)
    mask_col = (ids != 0).astype(jnp.float32)[:, None]              # (B*T, 1)
    x_slab = jnp.concatenate([emb_flat, mask_col], axis=-1)         # (B*T, E+1)

    kern = functools.partial(_fused_forward_kernel, B=B, T=T, lay=lay)
    return pl.pallas_call(
        kern,
        out_shape=jax.ShapeDtypeStruct((B, cfg["label_size"]), jnp.float32),
        in_specs=[_vmem()] * 3,
        out_specs=_vmem(),
        # TODO(synk): for large B switch to a ("parallel",) batch grid with tiled
        # BlockSpecs sized for v7x's 64 MiB VMEM and set vmem_limit_bytes.
    )(x_slab, packed["w"], packed["p"])


# ---------------------------------------------------------------------------
# Pure-JAX f32 reference (mirrors the PyTorch module in eval mode).
# ---------------------------------------------------------------------------
def reference_forward(params, x, cfg=CFG):
    B, T = x.shape
    mask = (x != 0).astype(jnp.float32)[:, :, None]                 # (B, T, 1)
    emb = jnp.take(params["emb"], x, axis=0)                        # (B, T, E)

    def conv_same(h, w, b):                                         # w: (K, cin, cout)
        K = w.shape[0]
        p = (K - 1) // 2
        hp = jnp.pad(h, ((0, 0), (p, p), (0, 0)))
        out = sum(jnp.einsum("btc,co->bto", hp[:, k:k + T, :], w[k]) for k in range(K))
        return out + b.reshape(1, 1, -1)

    def ln(v, g, b):
        mu = v.mean(-1, keepdims=True)
        c = v - mu
        return c * jax.lax.rsqrt((c * c).mean(-1, keepdims=True) + LN_EPS) * g + b

    dn_ks = cfg["densenet_kernels"]
    merge = []
    for j in range(len(dn_ks[0])):
        results = []
        for i in range(len(dn_ks)):
            h_in = emb if i == 0 else jnp.concatenate(results, axis=-1)
            w, b = params["densenet"][i][j]
            results.append(jnp.maximum(conv_same(h_in, w, b) * mask, 0.0))
        merge.append(results[-1])

    wl, bl = params["conv_last"]
    dense = jnp.maximum(
        conv_same(jnp.concatenate([emb] + merge, axis=-1), wl, bl) * mask, 0.0)
    g1, b1 = params["ln_densenet"]
    dense = ln(dense, g1, b1)

    pooled = []
    for (w, b), K in zip(params["textcnn"], cfg["kernel_sizes"]):
        out = sum(jnp.einsum("btc,co->bto", dense[:, k:k + T - K + 1, :], w[k])
                  for k in range(K))
        pooled.append(jnp.max(jnp.maximum(out + b.reshape(1, 1, -1), 0.0), axis=1))
    feat = jnp.concatenate(pooled, axis=-1)
    g2, b2 = params["ln_textcnn"]
    feat = ln(feat, g2, b2)

    fw, fb = params["fc"]
    logits = feat @ fw + fb.reshape(1, -1)
    return jax.nn.softmax(logits, axis=-1)


if __name__ == "__main__":
    key = jax.random.PRNGKey(0)
    kp, kx = jax.random.split(key)

    params = init_params(kp, CFG)
    packed = pack_params(params, CFG)                      # one-time slab packing

    B, T = 2, CFG["n_ctx"]
    x = jax.random.randint(kx, (B, T), 0, CFG["vocab"], dtype=jnp.int32)
    x = x.at[1, 12:].set(0)                                # padding tokens -> mask

    out = jax.block_until_ready(jax.jit(forward)(packed, x))

    assert out.shape == (B, CFG["label_size"])
    # softmax rows ~ 1 (approx reciprocal on the EUP, so allow a small slack)
    assert bool(jnp.allclose(jnp.sum(out, axis=-1), 1.0, atol=2e-2))
    # match the pure-JAX f32 reference (kernel uses bf16 MXU inputs)
    ref = reference_forward(params, x, CFG)
    assert bool(jnp.allclose(out, ref, atol=5e-2)), (out, ref)
    print("KERNEL_OK")
</pallas_src>

<mosaic_0001>
module attributes {stable_mosaic.version = 11 : i64} {
  func.func @_fused_forward_kernel(%arg0: memref<32x33xf32, #tpu.memory_space<vmem>>, %arg1: memref<832x64xbf16, #tpu.memory_space<vmem>>, %arg2: memref<9x64xf32, #tpu.memory_space<vmem>>, %arg3: memref<2x4xf32, #tpu.memory_space<vmem>>) attributes {dimension_semantics = [], scalar_prefetch = 0 : i64, scratch_operands = 0 : i64, tpu.core_type = #tpu.core_type<tc>} {
    %c0 = arith.constant 0 : index
    %c0_0 = arith.constant 0 : index
    %0 = vector.load %arg0[%c0, %c0_0] : memref<32x33xf32, #tpu.memory_space<vmem>>, vector<32x33xf32>
    %1 = vector.extract_strided_slice %0 {offsets = [0, 0], sizes = [32, 32], strides = [1, 1]} : vector<32x33xf32> to vector<32x32xf32>
    %2 = vector.extract_strided_slice %0 {offsets = [0, 32], sizes = [32, 1], strides = [1, 1]} : vector<32x33xf32> to vector<32x1xf32>
    %3 = tpu.iota {dimensions = array<i32: 0>} : vector<32x1xi32>
    %c15_i32 = arith.constant 15 : i32
    %4 = vector.broadcast %c15_i32 : i32 to vector<32x1xi32>
    %5 = arith.andi %3, %4 : vector<32x1xi32>
    %c2_i32 = arith.constant 2 : i32
    %6 = tpu.dynamic_rotate %1 by %c2_i32 dim 0 : vector<32x32xf32>, i32 -> vector<32x32xf32>
    %c2_i32_1 = arith.constant 2 : i32
    %7 = vector.broadcast %c2_i32_1 : i32 to vector<32x1xi32>
    %8 = arith.cmpi sge, %5, %7 : vector<32x1xi32>
    %cst = arith.constant 0.000000e+00 : f32
    %9 = vector.shape_cast %8 : vector<32x1xi1> to vector<32x1xi1>
    %10 = vector.broadcast %9 : vector<32x1xi1> to vector<32x32xi1>
    %11 = vector.broadcast %cst : f32 to vector<32x32xf32>
    %12 = arith.select %10, %6, %11 : vector<32x32xi1>, vector<32x32xf32>
    %c1_i32 = arith.constant 1 : i32
    %13 = tpu.dynamic_rotate %1 by %c1_i32 dim 0 : vector<32x32xf32>, i32 -> vector<32x32xf32>
    %c1_i32_2 = arith.constant 1 : i32
    %14 = vector.broadcast %c1_i32_2 : i32 to vector<32x1xi32>
    %15 = arith.cmpi sge, %5, %14 : vector<32x1xi32>
    %cst_3 = arith.constant 0.000000e+00 : f32
    %16 = vector.shape_cast %15 : vector<32x1xi1> to vector<32x1xi1>
    %17 = vector.broadcast %16 : vector<32x1xi1> to vector<32x32xi1>
    %18 = vector.broadcast %cst_3 : f32 to vector<32x32xf32>
    %19 = arith.select %17, %13, %18 : vector<32x32xi1>, vector<32x32xf32>
    %c31_i32 = arith.constant 31 : i32
    %20 = tpu.dynamic_rotate %1 by %c31_i32 dim 0 : vector<32x32xf32>, i32 -> vector<32x32xf32>
    %c15_i32_4 = arith.constant 15 : i32
    %21 = vector.broadcast %c15_i32_4 : i32 to vector<32x1xi32>
    %22 = arith.cmpi slt, %5, %21 : vector<32x1xi32>
    %cst_5 = arith.constant 0.000000e+00 : f32
    %23 = vector.shape_cast %22 : vector<32x1xi1> to vector<32x1xi1>
    %24 = vector.broadcast %23 : vector<32x1xi1> to vector<32x32xi1>
    %25 = vector.broadcast %cst_5 : f32 to vector<32x32xf32>
    %26 = arith.select %24, %20, %25 : vector<32x32xi1>, vector<32x32xf32>
    %c30_i32 = arith.constant 30 : i32
    %27 = tpu.dynamic_rotate %1 by %c30_i32 dim 0 : vector<32x32xf32>, i32 -> vector<32x32xf32>
    %c14_i32 = arith.constant 14 : i32
    %28 = vector.broadcast %c14_i32 : i32 to vector<32x1xi32>
    %29 = arith.cmpi slt, %5, %28 : vector<32x1xi32>
    %cst_6 = arith.constant 0.000000e+00 : f32
    %30 = vector.shape_cast %29 : vector<32x1xi1> to vector<32x1xi1>
    %31 = vector.broadcast %30 : vector<32x1xi1> to vector<32x32xi1>
    %32 = vector.broadcast %cst_6 : f32 to vector<32x32xf32>
    %33 = arith.select %31, %27, %32 : vector<32x32xi1>, vector<32x32xf32>
    %34 = tpu.concatenate %12, %19, %1, %26, %33 in 1 : vector<32x32xf32>, vector<32x32xf32>, vector<32x32xf32>, vector<32x32xf32>, vector<32x32xf32> -> vector<32x160xf32>
    %35 = arith.truncf %34 : vector<32x160xf32> to vector<32x160xbf16>
    %c0_7 = arith.constant 0 : index
    %c0_8 = arith.constant 0 : index
    %36 = vector.load %arg1[%c0_7, %c0_8] : memref<832x64xbf16, #tpu.memory_space<vmem>>, vector<160x64xbf16>
    %cst_9 = arith.constant dense<0.000000e+00> : vector<32x64xf32>
    %37 = tpu.matmul %35, %36, %cst_9 {dimension_numbers = #tpu.dot_dimension_numbers<[1], [0], [0], [1], [0, 0, 1, 1], [], []>} : vector<32x160xbf16>, vector<160x64xbf16>, vector<32x64xf32> -> vector<32x64xf32>
    %c0_10 = arith.constant 0 : index
    %c0_11 = arith.constant 0 : index
    %38 = vector.load %arg2[%c0_10, %c0_11] : memref<9x64xf32, #tpu.memory_space<vmem>>, vector<1x64xf32>
    %39 = vector.broadcast %38 : vector<1x64xf32> to vector<32x64xf32>
    %40 = arith.addf %37, %39 : vector<32x64xf32>
    %41 = vector.broadcast %2 : vector<32x1xf32> to vector<32x64xf32>
    %42 = arith.mulf %40, %41 : vector<32x64xf32>
    %cst_12 = arith.constant 0.000000e+00 : f32
    %43 = vector.broadcast %cst_12 : f32 to vector<32x64xf32>
    %44 = arith.maximumf %42, %43 : vector<32x64xf32>
    %c2_i32_13 = arith.constant 2 : i32
    %45 = tpu.dynamic_rotate %44 by %c2_i32_13 dim 0 : vector<32x64xf32>, i32 -> vector<32x64xf32>
    %c2_i32_14 = arith.constant 2 : i32
    %46 = vector.broadcast %c2_i32_14 : i32 to vector<32x1xi32>
    %47 = arith.cmpi sge, %5, %46 : vector<32x1xi32>
    %cst_15 = arith.constant 0.000000e+00 : f32
    %48 = vector.shape_cast %47 : vector<32x1xi1> to vector<32x1xi1>
    %49 = vector.broadcast %48 : vector<32x1xi1> to vector<32x64xi1>
    %50 = vector.broadcast %cst_15 : f32 to vector<32x64xf32>
    %51 = arith.select %49, %45, %50 : vector<32x64xi1>, vector<32x64xf32>
    %c1_i32_16 = arith.constant 1 : i32
    %52 = tpu.dynamic_rotate %44 by %c1_i32_16 dim 0 : vector<32x64xf32>, i32 -> vector<32x64xf32>
    %c1_i32_17 = arith.constant 1 : i32
    %53 = vector.broadcast %c1_i32_17 : i32 to vector<32x1xi32>
    %54 = arith.cmpi sge, %5, %53 : vector<32x1xi32>
    %cst_18 = arith.constant 0.000000e+00 : f32
    %55 = vector.shape_cast %54 : vector<32x1xi1> to vector<32x1xi1>
    %56 = vector.broadcast %55 : vector<32x1xi1> to vector<32x64xi1>
    %57 = vector.broadcast %cst_18 : f32 to vector<32x64xf32>
    %58 = arith.select %56, %52, %57 : vector<32x64xi1>, vector<32x64xf32>
    %c31_i32_19 = arith.constant 31 : i32
    %59 = tpu.dynamic_rotate %44 by %c31_i32_19 dim 0 : vector<32x64xf32>, i32 -> vector<32x64xf32>
    %c15_i32_20 = arith.constant 15 : i32
    %60 = vector.broadcast %c15_i32_20 : i32 to vector<32x1xi32>
    %61 = arith.cmpi slt, %5, %60 : vector<32x1xi32>
    %cst_21 = arith.constant 0.000000e+00 : f32
    %62 = vector.shape_cast %61 : vector<32x1xi1> to vector<32x1xi1>
    %63 = vector.broadcast %62 : vector<32x1xi1> to vector<32x64xi1>
    %64 = vector.broadcast %cst_21 : f32 to vector<32x64xf32>
    %65 = arith.select %63, %59, %64 : vector<32x64xi1>, vector<32x64xf32>
    %c30_i32_22 = arith.constant 30 : i32
    %66 = tpu.dynamic_rotate %44 by %c30_i32_22 dim 0 : vector<32x64xf32>, i32 -> vector<32x64xf32>
    %c14_i32_23 = arith.constant 14 : i32
    %67 = vector.broadcast %c14_i32_23 : i32 to vector<32x1xi32>
    %68 = arith.cmpi slt, %5, %67 : vector<32x1xi32>
    %cst_24 = arith.constant 0.000000e+00 : f32
    %69 = vector.shape_cast %68 : vector<32x1xi1> to vector<32x1xi1>
    %70 = vector.broadcast %69 : vector<32x1xi1> to vector<32x64xi1>
    %71 = vector.broadcast %cst_24 : f32 to vector<32x64xf32>
    %72 = arith.select %70, %66, %71 : vector<32x64xi1>, vector<32x64xf32>
    %73 = tpu.concatenate %51, %58, %44, %65, %72 in 1 : vector<32x64xf32>, vector<32x64xf32>, vector<32x64xf32>, vector<32x64xf32>, vector<32x64xf32> -> vector<32x320xf32>
    %74 = arith.truncf %73 : vector<32x320xf32> to vector<32x320xbf16>
    %c160 = arith.constant 160 : index
    %c0_25 = arith.constant 0 : index
    %75 = vector.load %arg1[%c160, %c0_25] : memref<832x64xbf16, #tpu.memory_space<vmem>>, vector<320x64xbf16>
    %cst_26 = arith.constant dense<0.000000e+00> : vector<32x64xf32>
    %76 = tpu.matmul %74, %75, %cst_26 {dimension_numbers = #tpu.dot_dimension_numbers<[1], [0], [0], [1], [0, 0, 1, 1], [], []>} : vector<32x320xbf16>, vector<320x64xbf16>, vector<32x64xf32> -> vector<32x64xf32>
    %c1 = arith.constant 1 : index
    %c0_27 = arith.constant 0 : index
    %77 = vector.load %arg2[%c1, %c0_27] : memref<9x64xf32, #tpu.memory_space<vmem>>, vector<1x64xf32>
    %78 = vector.broadcast %77 : vector<1x64xf32> to vector<32x64xf32>
    %79 = arith.addf %76, %78 : vector<32x64xf32>
    %80 = vector.broadcast %2 : vector<32x1xf32> to vector<32x64xf32>
    %81 = arith.mulf %79, %80 : vector<32x64xf32>
    %cst_28 = arith.constant 0.000000e+00 : f32
    %82 = vector.broadcast %cst_28 : f32 to vector<32x64xf32>
    %83 = arith.maximumf %81, %82 : vector<32x64xf32>
    %84 = tpu.concatenate %1, %83 in 1 : vector<32x32xf32>, vector<32x64xf32> -> vector<32x96xf32>
    %85 = arith.truncf %84 : vector<32x96xf32> to vector<32x96xbf16>
    %c480 = arith.constant 480 : index
    %c0_29 = arith.constant 0 : index
    %86 = vector.load %arg1[%c480, %c0_29] : memref<832x64xbf16, #tpu.memory_space<vmem>>, vector<96x64xbf16>
    %cst_30 = arith.constant dense<0.000000e+00> : vector<32x64xf32>
    %87 = tpu.matmul %85, %86, %cst_30 {dimension_numbers = #tpu.dot_dimension_numbers<[1], [0], [0], [1], [0, 0, 1, 1], [], []>} : vector<32x96xbf16>, vector<96x64xbf16>, vector<32x64xf32> -> vector<32x64xf32>
    %c2 = arith.constant 2 : index
    %c0_31 = arith.constant 0 : index
    %88 = vector.load %arg2[%c2, %c0_31] : memref<9x64xf32, #tpu.memory_space<vmem>>, vector<1x64xf32>
    %89 = vector.broadcast %88 : vector<1x64xf32> to vector<32x64xf32>
    %90 = arith.addf %87, %89 : vector<32x64xf32>
    %91 = vector.broadcast %2 : vector<32x1xf32> to vector<32x64xf32>
    %92 = arith.mulf %90, %91 : vector<32x64xf32>
    %cst_32 = arith.constant 0.000000e+00 : f32
    %93 = vector.broadcast %cst_32 : f32 to vector<32x64xf32>
    %94 = arith.maximumf %92, %93 : vector<32x64xf32>
    %cst_33 = arith.constant dense<0.000000e+00> : vector<32xf32>
    %95 = vector.multi_reduction <add>, %94, %cst_33 [1] : vector<32x64xf32> to vector<32xf32>
    %96 = vector.shape_cast %95 : vector<32xf32> to vector<32x1xf32>
    %cst_34 = arith.constant 6.400000e+01 : f32
    %97 = vector.broadcast %cst_34 : f32 to vector<32x1xf32>
    %98 = arith.divf %96, %97 : vector<32x1xf32>
    %99 = vector.broadcast %98 : vector<32x1xf32> to vector<32x64xf32>
    %100 = arith.subf %94, %99 : vector<32x64xf32>
    %101 = arith.mulf %100, %100 : vector<32x64xf32>
    %cst_35 = arith.constant dense<0.000000e+00> : vector<32xf32>
    %102 = vector.multi_reduction <add>, %101, %cst_35 [1] : vector<32x64xf32> to vector<32xf32>
    %103 = vector.shape_cast %102 : vector<32xf32> to vector<32x1xf32>
    %cst_36 = arith.constant 6.400000e+01 : f32
    %104 = vector.broadcast %cst_36 : f32 to vector<32x1xf32>
    %105 = arith.divf %103, %104 : vector<32x1xf32>
    %cst_37 = arith.constant 9.99999974E-6 : f32
    %106 = vector.broadcast %cst_37 : f32 to vector<32x1xf32>
    %107 = arith.addf %105, %106 : vector<32x1xf32>
    %108 = math.rsqrt %107 : vector<32x1xf32>
    %109 = vector.broadcast %108 : vector<32x1xf32> to vector<32x64xf32>
    %110 = arith.mulf %100, %109 : vector<32x64xf32>
    %c4 = arith.constant 4 : index
    %c0_38 = arith.constant 0 : index
    %111 = vector.load %arg2[%c4, %c0_38] : memref<9x64xf32, #tpu.memory_space<vmem>>, vector<1x64xf32>
    %112 = vector.broadcast %111 : vector<1x64xf32> to vector<32x64xf32>
    %113 = arith.mulf %110, %112 : vector<32x64xf32>
    %c5 = arith.constant 5 : index
    %c0_39 = arith.constant 0 : index
    %114 = vector.load %arg2[%c5, %c0_39] : memref<9x64xf32, #tpu.memory_space<vmem>>, vector<1x64xf32>
    %115 = vector.broadcast %114 : vector<1x64xf32> to vector<32x64xf32>
    %116 = arith.addf %113, %115 : vector<32x64xf32>
    %c31_i32_40 = arith.constant 31 : i32
    %117 = tpu.dynamic_rotate %116 by %c31_i32_40 dim 0 : vector<32x64xf32>, i32 -> vector<32x64xf32>
    %c30_i32_41 = arith.constant 30 : i32
    %118 = tpu.dynamic_rotate %116 by %c30_i32_41 dim 0 : vector<32x64xf32>, i32 -> vector<32x64xf32>
    %119 = tpu.concatenate %116, %117, %118 in 1 : vector<32x64xf32>, vector<32x64xf32>, vector<32x64xf32> -> vector<32x192xf32>
    %120 = arith.truncf %119 : vector<32x192xf32> to vector<32x192xbf16>
    %c576 = arith.constant 576 : index
    %c0_42 = arith.constant 0 : index
    %121 = vector.load %arg1[%c576, %c0_42] : memref<832x64xbf16, #tpu.memory_space<vmem>>, vector<192x64xbf16>
    %cst_43 = arith.constant dense<0.000000e+00> : vector<32x64xf32>
    %122 = tpu.matmul %120, %121, %cst_43 {dimension_numbers = #tpu.dot_dimension_numbers<[1], [0], [0], [1], [0, 0, 1, 1], [], []>} : vector<32x192xbf16>, vector<192x64xbf16>, vector<32x64xf32> -> vector<32x64xf32>
    %c3 = arith.constant 3 : index
    %c0_44 = arith.constant 0 : index
    %123 = vector.load %arg2[%c3, %c0_44] : memref<9x64xf32, #tpu.memory_space<vmem>>, vector<1x64xf32>
    %124 = vector.broadcast %123 : vector<1x64xf32> to vector<32x64xf32>
    %125 = arith.addf %122, %124 : vector<32x64xf32>
    %cst_45 = arith.constant 0.000000e+00 : f32
    %126 = vector.broadcast %cst_45 : f32 to vector<32x64xf32>
    %127 = arith.maximumf %125, %126 : vector<32x64xf32>
    %128 = tpu.iota {dimensions = array<i32: 1>} : vector<1x64xi32>
    %c0_i32 = arith.constant 0 : i32
    %129 = vector.broadcast %c0_i32 : i32 to vector<1x64xi32>
    %c0_i32_46 = arith.constant 0 : i32
    %130 = vector.broadcast %c0_i32_46 : i32 to vector<1x64xi32>
    %131 = arith.cmpi sge, %128, %130 : vector<1x64xi32>
    %c32_i32 = arith.constant 32 : i32
    %132 = vector.broadcast %c32_i32 : i32 to vector<1x64xi32>
    %133 = arith.cmpi slt, %128, %132 : vector<1x64xi32>
    %134 = arith.andi %131, %133 : vector<1x64xi1>
    %c15_i32_47 = arith.constant 15 : i32
    %135 = vector.broadcast %c15_i32_47 : i32 to vector<1x64xi32>
    %136 = arith.select %134, %135, %129 : vector<1x64xi1>, vector<1x64xi32>
    %c32_i32_48 = arith.constant 32 : i32
    %137 = vector.broadcast %c32_i32_48 : i32 to vector<1x64xi32>
    %138 = arith.cmpi sge, %128, %137 : vector<1x64xi32>
    %c64_i32 = arith.constant 64 : i32
    %139 = vector.broadcast %c64_i32 : i32 to vector<1x64xi32>
    %140 = arith.cmpi slt, %128, %139 : vector<1x64xi32>
    %141 = arith.andi %138, %140 : vector<1x64xi1>
    %c14_i32_49 = arith.constant 14 : i32
    %142 = vector.broadcast %c14_i32_49 : i32 to vector<1x64xi32>
    %143 = arith.select %141, %142, %136 : vector<1x64xi1>, vector<1x64xi32>
    %144 = vector.broadcast %5 : vector<32x1xi32> to vector<32x64xi32>
    %145 = vector.broadcast %143 : vector<1x64xi32> to vector<32x64xi32>
    %146 = arith.cmpi slt, %144, %145 : vector<32x64xi32>
    %cst_50 = arith.constant 0.000000e+00 : f32
    %147 = vector.broadcast %cst_50 : f32 to vector<32x64xf32>
    %148 = arith.select %146, %127, %147 : vector<32x64xi1>, vector<32x64xf32>
    %149 = vector.shape_cast %148 : vector<32x64xf32> to vector<2x16x64xf32>
    %cst_51 = arith.constant dense<0xFF800000> : vector<2x64xf32>
    %150 = vector.multi_reduction <maximumf>, %149, %cst_51 [1] : vector<2x16x64xf32> to vector<2x64xf32>
    %cst_52 = arith.constant dense<0.000000e+00> : vector<2xf32>
    %151 = vector.multi_reduction <add>, %150, %cst_52 [1] : vector<2x64xf32> to vector<2xf32>
    %152 = vector.shape_cast %151 : vector<2xf32> to vector<2x1xf32>
    %cst_53 = arith.constant 6.400000e+01 : f32
    %153 = vector.broadcast %cst_53 : f32 to vector<2x1xf32>
    %154 = arith.divf %152, %153 : vector<2x1xf32>
    %155 = vector.broadcast %154 : vector<2x1xf32> to vector<2x64xf32>
    %156 = arith.subf %150, %155 : vector<2x64xf32>
    %157 = arith.mulf %156, %156 : vector<2x64xf32>
    %cst_54 = arith.constant dense<0.000000e+00> : vector<2xf32>
    %158 = vector.multi_reduction <add>, %157, %cst_54 [1] : vector<2x64xf32> to vector<2xf32>
    %159 = vector.shape_cast %158 : vector<2xf32> to vector<2x1xf32>
    %cst_55 = arith.constant 6.400000e+01 : f32
    %160 = vector.broadcast %cst_55 : f32 to vector<2x1xf32>
    %161 = arith.divf %159, %160 : vector<2x1xf32>
    %cst_56 = arith.constant 9.99999974E-6 : f32
    %162 = vector.broadcast %cst_56 : f32 to vector<2x1xf32>
    %163 = arith.addf %161, %162 : vector<2x1xf32>
    %164 = math.rsqrt %163 : vector<2x1xf32>
    %165 = vector.broadcast %164 : vector<2x1xf32> to vector<2x64xf32>
    %166 = arith.mulf %156, %165 : vector<2x64xf32>
    %c6 = arith.constant 6 : index
    %c0_57 = arith.constant 0 : index
    %167 = vector.load %arg2[%c6, %c0_57] : memref<9x64xf32, #tpu.memory_space<vmem>>, vector<1x64xf32>
    %168 = vector.broadcast %167 : vector<1x64xf32> to vector<2x64xf32>
    %169 = arith.mulf %166, %168 : vector<2x64xf32>
    %c7 = arith.constant 7 : index
    %c0_58 = arith.constant 0 : index
    %170 = vector.load %arg2[%c7, %c0_58] : memref<9x64xf32, #tpu.memory_space<vmem>>, vector<1x64xf32>
    %171 = vector.broadcast %170 : vector<1x64xf32> to vector<2x64xf32>
    %172 = arith.addf %169, %171 : vector<2x64xf32>
    %173 = arith.truncf %172 : vector<2x64xf32> to vector<2x64xbf16>
    %c768 = arith.constant 768 : index
    %c0_59 = arith.constant 0 : index
    %174 = vector.load %arg1[%c768, %c0_59] : memref<832x64xbf16, #tpu.memory_space<vmem>>, vector<64x64xbf16>
    %cst_60 = arith.constant dense<0.000000e+00> : vector<2x64xf32>
    %175 = tpu.matmul %173, %174, %cst_60 {dimension_numbers = #tpu.dot_dimension_numbers<[1], [0], [0], [1], [0, 0, 1, 1], [], []>} : vector<2x64xbf16>, vector<64x64xbf16>, vector<2x64xf32> -> vector<2x64xf32>
    %176 = vector.extract_strided_slice %175 {offsets = [0, 0], sizes = [2, 4], strides = [1, 1]} : vector<2x64xf32> to vector<2x4xf32>
    %c8 = arith.constant 8 : index
    %c0_61 = arith.constant 0 : index
    %177 = vector.load %arg2[%c8, %c0_61] : memref<9x64xf32, #tpu.memory_space<vmem>>, vector<1x4xf32>
    %178 = vector.broadcast %177 : vector<1x4xf32> to vector<2x4xf32>
    %179 = arith.addf %176, %178 : vector<2x4xf32>
    %cst_62 = arith.constant dense<0xFF800000> : vector<2xf32>
    %180 = vector.multi_reduction <maximumf>, %179, %cst_62 [1] : vector<2x4xf32> to vector<2xf32>
    %181 = vector.shape_cast %180 : vector<2xf32> to vector<2x1xf32>
    %182 = vector.broadcast %181 : vector<2x1xf32> to vector<2x4xf32>
    %183 = arith.subf %179, %182 : vector<2x4xf32>
    %184 = math.exp %183 : vector<2x4xf32>
    %cst_63 = arith.constant dense<0.000000e+00> : vector<2xf32>
    %185 = vector.multi_reduction <add>, %184, %cst_63 [1] : vector<2x4xf32> to vector<2xf32>
    %186 = vector.shape_cast %185 : vector<2xf32> to vector<2x1xf32>
    %187 = tpu.reciprocal %186 {approx = true} : vector<2x1xf32> -> vector<2x1xf32>
    %188 = vector.broadcast %187 : vector<2x1xf32> to vector<2x4xf32>
    %189 = arith.mulf %184, %188 : vector<2x4xf32>
    %c0_64 = arith.constant 0 : index
    %c0_65 = arith.constant 0 : index
    %190 = vector.load %arg3[%c0_64, %c0_65] : memref<2x4xf32, #tpu.memory_space<vmem>>, vector<2x4xf32>
    tpu.vector_store %arg3[%c0_64, %c0_65], %189 {strides = array<i32>} : memref<2x4xf32, #tpu.memory_space<vmem>>, vector<2x4xf32>,
    return
  }
}

</mosaic_0001>

<bundles_post_ra>
// kernel: forward.1
= control target key start
LH: loop header
LB: loop body
LE: loop exit
PB: predicated region body
PF: predicated region fallthrough
CT: control target
= control target key end

     0   :  { %v20_v3 = vlaneseq  ;;  %v1667_v8 = vmov 0   ;;  %s1668_s25 = smov 32   ;;  %s1669_s26 = smov 96   ;;  %vm177_vm8 = vcmask 261120   ;;  %v1671_v56 = vmov 32   ;;  %s2240_s0 = inlined_call_operand.vmem [shape: f32[32,33], index: 0, kind: input, shape index: {}]   ;;  %s2241_s1 = inlined_call_operand.vmem [shape: bf16[832,64], index: 1, kind: input, shape index: {}]   ;;  %s2242_s2 = inlined_call_operand.vmem [shape: f32[9,64], index: 2, kind: input, shape index: {}]   ;;  %s2243_s3 = inlined_call_operand.hbm [shape: f32[2,4], index: 3, kind: output, shape index: {}]  }
   0x1   :  { %v1698_v0 = vld [vmem:[%s2240_s0] sm:$0xff]  ;;  %v1703_v1 = vld [vmem:[%s2240_s0 + $0x8] sm:$0xff]  ;;  %v1708_v2 = vld [vmem:[%s2240_s0 + $0x18] sm:$0xff]  ;;  %287 = vmatprep.subr.bf16.mxu0 %v1667_v8  ;;  %s1670_s29 = smov 64   ;;  %1538 = vset.pattern.permute.xlu1 %v1671_v56 }
   0x2   :  { %v54_v4 = vrot.slane %v1698_v0, 7  ;;  %v55_v5 = vrot.slane %v1703_v1, 7  ;;  %v57_v6 = vrot.slane %v1708_v2, 7  ;;  %v1716_v7 = vld [vmem:[%s2240_s0 + $0x10] sm:$0xff]  ;;  %v1720_v9 = vshrl.u32 %v20_v3, 7  ;;  %v1579_v12 = vld [vmem:[%s2241_s1 + $0x38] sm:$0xff]   ;;  %1537 = vset.pattern.permute.xlu0 %v1671_v56 }
   0x3   :  { %v80_v10 = vrot.slane %v1703_v1, 1  ;;  %v81_v11 = vrot.slane %v1716_v7, 1  ;;  %v79_v13 = vrot.slane %v1698_v0, 1  ;;  %v56_v14 = vrot.slane %v1716_v7, 7  ;;  %288 = vmatpush1.bf16.msra.mxu0 %v1579_v12  ;;  %v1580_v20 = vld [vmem:[%s2241_s1 + $0x30] sm:$0xff]   ;;  %v1581_v27 = vld [vmem:[%s2241_s1 + $0x28] sm:$0xff]  }
   0x4   :  { %v1730_v15 = vand.u32 15, %v1720_v9  ;;  %vm58_vm0 = vcmp.lt.s32.totalorder %v1720_v9, 1  ;;  %v22_v16 = vadd.s32 8, %v1720_v9  ;;  %vm83_vm1 = vcmp.lt.s32.totalorder %v1720_v9, 7  ;;  %289 = vmatprep.subr.bf16.mxu0 %v1667_v8  ;;  %v1582_v39 = vld [vmem:[%s2241_s1 + $0x20] sm:$0xff]   ;;  %v1583_v46 = vld [vmem:[%s2241_s1 + $0x18] sm:$0xff]  }
   0x5   :  { %v61_v17 = vsel %vm58_vm0, %v54_v4, %v55_v5  ;;  %v62_v18 = vsel %vm58_vm0, %v57_v6, %v54_v4  ;;  %v82_v19 = vrot.slane %v1708_v2, 1  ;;  %v85_v22 = vsel %vm83_vm1, %v80_v10, %v81_v11  ;;  %v1584_v50 = vld [vmem:[%s2241_s1 + $0x10] sm:$0xff]   ;;  %v1585_v57 = vld [vmem:[%s2241_s1 + $0x8] sm:$0xff]   ;;  %v1586_v60 = vld [vmem:[%s2241_s1] sm:$0xff]  }
   0x6   :  { %vm63_vm2 = vcmp.ge.s32.totalorder %v1730_v15, 1  ;;  %v1745_v21 = vand.u32 15, %v22_v16  ;;  %v23_v23 = vadd.s32 16, %v1720_v9  ;;  %v86_v25 = vsel %vm83_vm1, %v79_v13, %v80_v10  ;;  %v1587_v61 = vld [vmem:[%s2241_s1 + $0x48] sm:$0xff]   ;;  %v1588_v62 = vld [vmem:[%s2241_s1 + $0x40] sm:$0xff]  }
   0x7   :  { %v75_v24 = vsel %vm63_vm2, %v62_v18, 0.0  ;;  %v24_v26 = vadd.s32 24, %v1720_v9  ;;  %v60_v30 = vsel %vm58_vm0, %v55_v5, %v56_v14  ;;  %290 = vmatpush1.bf16.msra.mxu0 %v1580_v20  ;;  %v59_v32 = vsel %vm58_vm0, %v56_v14, %v57_v6 }
   0x8   :  { %v1507_v28 = vpack.i.bf16 %v61_v17, %v75_v24  ;;  %vm89_vm3 = vcmp.lt.s32.totalorder %v1745_v21, 15  ;;  %v1759_v29 = vand.u32 15, %v23_v23  ;;  %291 = vmatprep.subr.bf16.mxu0 %v1667_v8  ;;  %v1512_v35 = vpack.i.bf16 %v1703_v1, %v1698_v0 }
   0x9   :  { %v101_v31 = vsel %vm89_vm3, %v85_v22, 0.0  ;;  %v1767_v33 = vand.u32 15, %v24_v26  ;;  %v87_v36 = vsel %vm83_vm1, %v82_v19, %v79_v13  ;;  %v84_v40 = vsel %vm83_vm1, %v81_v11, %v82_v19 }
   0xa   :  { %1508 = vrot.lane.b32.xlu0 %v1507_v28, %s1668_s25  ;;  %v1522_v34 = vpack.i.bf16 %v101_v31, %v86_v25  ;;  %vm65_vm4 = vcmp.ge.s32.totalorder %v1759_v29, 1  ;;  %v1517_v42 = vpack.i.bf16 %v1708_v2, %v1716_v7  ;;  %v104_v43 = vrot.slane %v1698_v0, 2 }
   0xb   :  { %v77_v37 = vsel %vm65_vm4, %v60_v30, 0.0  ;;  %vm91_vm5 = vcmp.lt.s32.totalorder %v1767_v33, 15  ;;  %292 = vmatpush1.bf16.msra.mxu0 %v1581_v27  ;;  %v105_v44 = vrot.slane %v1703_v1, 2  ;;  %v106_v47 = vrot.slane %v1716_v7, 2 }
   0xc   :  { %1523 = vrot.lane.b32.xlu1 %v1522_v34, %s1669_s26  ;;  %v1527_v38 = vpack.i.bf16 %v59_v32, %v77_v37  ;;  %v103_v41 = vsel %vm91_vm5, %v87_v36, 0.0  ;;  %293 = vmatprep.subr.bf16.mxu0 %v1667_v8  ;;  %vm108_vm6 = vcmp.lt.s32.totalorder %v1720_v9, 6  ;;  %vm114_vm7 = vcmp.lt.s32.totalorder %v1745_v21, 14 }
   0xd   :  { %v1532_v45 = vpack.i.bf16 %v103_v41, %v84_v40  ;;  %v110_v48 = vsel %vm108_vm6, %v105_v44, %v106_v47  ;;  %v111_v49 = vsel %vm108_vm6, %v104_v43, %v105_v44  ;;  %v107_v52 = vrot.slane %v1708_v2, 2 }
   0xe   :  { %1513 = vrot.lane.b32.xlu0 %v1512_v35, %s1670_s29  ;;  %v126_v51 = vsel %vm114_vm7, %v110_v48, 0.0  ;;  %vm116_vm9 = vcmp.lt.s32.totalorder %v1767_v33, 14 }
   0xf   :  { %294 = vmatpush1.bf16.msra.mxu0 %v1582_v39  ;;  %v193_v53 = vpack.c.bf16 %v126_v51, %v111_v49  ;;  %v1815_v54 = vsel %vm108_vm6, %v106_v47, %v107_v52  ;;  %v112_v55 = vsel %vm108_vm6, %v107_v52, %v104_v43 }
  0x10   :  { %1528 = vrot.lane.b32.xlu1 %v1527_v38, %s1668_s25  ;;  %295 = vmatprep.subr.bf16.mxu0 %v1667_v8  ;;  %v1825_v58 = vsel %vm116_vm9, %v112_v55, 0.0 }
  0x11   :  { %1353 = vmatprep.mubr.msk.bf16.mxu0 %vm177_vm8, %v193_v53  ;;  %v195_v59 = vpack.c.bf16 %v1825_v58, %v1815_v54 }
  0x12   :  { %1518 = vrot.lane.b32.xlu0 %v1517_v42, %s1670_s29 }
  0x13   :  { %296 = vmatpush1.bf16.msra.mxu0 %v1583_v46 }
  0x14   :  { %1533 = vrot.lane.b32.xlu1 %v1532_v45, %s1669_s26  ;;  %297 = vmatprep.subr.bf16.mxu0 %v1667_v8 }
  0x16   :  { %341 = vperm.xlu0 %1537, %v1703_v1  }
  0x17   :  { %298 = vmatpush1.bf16.msra.mxu0 %v1584_v50 }
  0x18   :  { %345 = vperm.xlu1 %1538, %v1716_v7   ;;  %299 = vmatprep.subr.bf16.mxu0 %v1667_v8 }
  0x1a   :  { %349 = vperm.xlu0 %1537, %v1708_v2  }
  0x1b   :  { %300 = vmatpush1.bf16.msra.mxu0 %v1585_v57 }
  0x1c   :  { %337 = vperm.xlu1 %1538, %v1698_v0   ;;  %301 = vmatprep.subr.bf16.mxu0 %v1667_v8 }
  0x1f   :  { %302 = vmatpush1.bf16.msra.mxu0 %v1586_v60 }
  0x20   :  { %315 = vmatprep.subr.bf16.mxu0 %v1667_v8 }
  0x23   :  { %316 = vmatpush2.bf16.msra.mxu0 %v1587_v61 }
  0x24   :  { %317 = vmatprep.subr.bf16.mxu0 %v1667_v8 }
  0x27   :  { %318 = vmatpush2.bf16.msra.mxu0 %v1588_v62 }
  0x28   :  { %8 = vsyncpa [#allocation3], 0  ;;  %v32_v63 = vrot.slane %v1708_v2, 6  ;;  %v29_v4 = vrot.slane %v1698_v0, 6  ;;  %vm33_vm10 = vcmp.lt.s32.totalorder %v1720_v9, 2  ;;  %v30_v5 = vrot.slane %v1703_v1, 6 }
  0x29   :  { %v31_v6 = vrot.slane %v1716_v7, 6  ;;  %vm38_vm11 = vcmp.ge.s32.totalorder %v1730_v15, 2  ;;  %vm40_vm12 = vcmp.ge.s32.totalorder %v1759_v29, 2  ;;  %vm182_vm13 = vcmask 523264   ;;  %v1589_v52 = vld [vmem:[%s2241_s1 + $0xe8] sm:$0xff]   ;;  %v1590_v53 = vld [vmem:[%s2241_s1 + $0xe0] sm:$0xff]  }
  0x2a   :  { %v37_v11 = vsel %vm33_vm10, %v32_v63, %v29_v4  ;;  %v36_v16 = vsel %vm33_vm10, %v29_v4, %v30_v5  ;;  %vm187_vm14 = vcmask 785408   ;;  %1459 = vmatprep.subr.bf16.mxu0 %v1589_v52  ;;  %v1591_v54 = vld [vmem:[%s2241_s1 + $0xd8] sm:$0xff]   ;;  %v1592_v55 = vld [vmem:[%s2241_s1 + $0xd0] sm:$0xff]   ;;  %v1593_v56 = vld [vmem:[%s2241_s1 + $0xc8] sm:$0xff]  }
  0x2b   :  { %v50_v17 = vsel %vm38_vm11, %v37_v11, 0.0  ;;  %v35_v18 = vsel %vm33_vm10, %v30_v5, %v31_v6  ;;  %v34_v27 = vsel %vm33_vm10, %v31_v6, %v32_v63  ;;  %v1594_v57 = vld [vmem:[%s2241_s1 + $0x88] sm:$0xff]   ;;  %v1595_v58 = vld [vmem:[%s2241_s1 + $0xc0] sm:$0xff]   ;;  %1412 = vmatprep.subr.bf16.mxu1 %v1593_v56  ;;  %v1597_v60 = vld [vmem:[%s2241_s1 + $0xb8] sm:$0xff]  }
  0x2c   :  { %v52_v28 = vsel %vm40_vm12, %v35_v18, 0.0  ;;  %1413 = vmatpush3.bf16.msra.mxu1 %v1594_v57  ;;  %v1598_v61 = vld [vmem:[%s2241_s1 + $0x78] sm:$0xff]   ;;  %v1599_v62 = vld [vmem:[%s2241_s1 + $0xb0] sm:$0xff]   ;;  %v1601_v4 = vld [vmem:[%s2241_s1 + $0xa8] sm:$0xff]  }
  0x2d   :  { %1414 = vmatprep.subr.bf16.mxu1 %v1595_v58  ;;  %v1600_v63 = vld [vmem:[%s2241_s1 + $0x70] sm:$0xff]   ;;  %v1602_v5 = vld [vmem:[%s2241_s1 + $0x68] sm:$0xff]   ;;  %v1603_v6 = vld [vmem:[%s2241_s1 + $0xa0] sm:$0xff]  }
  0x7c   :  { %v1509_v10 = vpop.permute.xlu0 %1508 }
  0x7d   :  { %v1511_v12 = vunpack.i.h.bf16 %v1509_v10  ;;  %v1510_v13 = vunpack.i.l.bf16 %v1509_v10  ;;  %v1604_v10 = vld [vmem:[%s2241_s1 + $0x60] sm:$0xff]  }
  0x7e   :  { %v1524_v14 = vpop.permute.xlu1 %1523 }
  0x7f   :  { %v1526_v19 = vunpack.i.h.bf16 %v1524_v14  ;;  %v1525_v20 = vunpack.i.l.bf16 %v1524_v14  ;;  %v178_v25 = vsel %vm177_vm8, %v50_v17, %v1510_v13  ;;  %v179_v26 = vsel %vm177_vm8, %v36_v16, %v1511_v12  ;;  %v1342_v13 = vld [vmem:[%s2242_s2] ss:$0 sm:$0xff] }
  0x80   :  { %v1514_v22 = vpop.permute.xlu0 %1513 }
  0x81   :  { %v1516_v23 = vunpack.i.h.bf16 %v1514_v22  ;;  %v1515_v24 = vunpack.i.l.bf16 %v1514_v22 }
  0x82   :  { %v1529_v30 = vpop.permute.xlu1 %1528 }
  0x83   :  { %v183_v31 = vsel %vm182_vm13, %v178_v25, %v1515_v24  ;;  %v184_v32 = vsel %vm182_vm13, %v179_v26, %v1516_v23  ;;  %v1531_v34 = vunpack.i.h.bf16 %v1529_v30  ;;  %v1530_v35 = vunpack.i.l.bf16 %v1529_v30  ;;  %v1605_v26 = vld [vmem:[%s2241_s1 + $0x98] sm:$0xff]  }
  0x84   :  { %v1519_v36 = vpop.permute.xlu0 %1518  ;;  %v188_v37 = vsel %vm187_vm14, %v183_v31, %v1525_v20  ;;  %v189_v38 = vsel %vm187_vm14, %v184_v32, %v1526_v19 }
  0x85   :  { %v181_v39 = vsel %vm177_vm8, %v34_v27, %v1531_v34  ;;  %v180_v40 = vsel %vm177_vm8, %v52_v28, %v1530_v35  ;;  %v1521_v41 = vunpack.i.h.bf16 %v1519_v36  ;;  %v1520_v42 = vunpack.i.l.bf16 %v1519_v36  ;;  %v1606_v27 = vld [vmem:[%s2241_s1 + $0x58] sm:$0xff]   ;;  %v1607_v36 = vld [vmem:[%s2241_s1 + $0x90] sm:$0xff]  }
  0x86   :  { %v1534_v43 = vpop.permute.xlu1 %1533  ;;  %v192_v44 = vpack.c.bf16 %v189_v38, %v188_v37 }
  0x87   :  { %v1536_v45 = vunpack.i.h.bf16 %v1534_v43  ;;  %v1535_v46 = vunpack.i.l.bf16 %v1534_v43  ;;  %v186_v47 = vsel %vm182_vm13, %v181_v39, %v1521_v41  ;;  %v185_v48 = vsel %vm182_vm13, %v180_v40, %v1520_v42  ;;  %v1608_v39 = vld [vmem:[%s2241_s1 + $0x50] sm:$0xff]  }
  0x88   :  { %320 = vmatmul.mubr.bf16.vlgmr.msra.gmra.mxu0 %v192_v44 }
  0x89   :  { %1354 = vmatprep.mubr.msk.bf16.mxu0 %vm177_vm8, %v195_v59  ;;  %v190_v49 = vsel %vm187_vm14, %v185_v48, %v1535_v46  ;;  %v191_v50 = vsel %vm187_vm14, %v186_v47, %v1536_v45  ;;  %1460 = vmatpush3.bf16.msra.mxu0 %v1589_v52  ;;  %v1596_v59 = vld [vmem:[%s2241_s1 + $0x80] sm:$0xff]  }
  0x8a   :  { %v194_v51 = vpack.c.bf16 %v191_v50, %v190_v49  ;;  %1461 = vmatprep.subr.bf16.mxu0 %v1590_v53  ;;  %1415 = vmatpush3.bf16.msra.mxu1 %v1596_v59 }
  0x8b   :  { %1416 = vmatprep.subr.bf16.mxu1 %v1597_v60 }
  0x8d   :  { %1462 = vmatpush3.bf16.msra.mxu0 %v1590_v53 }
  0x8e   :  { %1463 = vmatprep.subr.bf16.mxu0 %v1591_v54  ;;  %1417 = vmatpush3.bf16.msra.mxu1 %v1598_v61 }
  0x8f   :  { %1418 = vmatprep.subr.bf16.mxu1 %v1599_v62 }
  0x90   :  { %328 = vmatmul.mubr.bf16.gmra.mxu0 %v194_v51 }
  0x91   :  { %1464 = vmatpush3.bf16.msra.mxu0 %v1591_v54  ;;  %v1934_v18 = vpop.permute.xlu0 %341 }
  0x92   :  { %1465 = vmatprep.subr.bf16.mxu0 %v1592_v55  ;;  %1419 = vmatpush3.bf16.msra.mxu1 %v1600_v63 }
  0x93   :  { %1420 = vmatprep.subr.bf16.mxu1 %v1601_v4  ;;  %v1929_v11 = vpop.permute.xlu1 %345 }
  0x95   :  { %1466 = vmatpush3.bf16.msra.mxu0 %v1592_v55  ;;  %v1959_v40 = vpop.permute.xlu0 %349 }
  0x96   :  { %1421 = vmatpush3.bf16.msra.mxu1 %v1602_v5 }
  0x97   :  { %1422 = vmatprep.subr.bf16.mxu1 %v1603_v6  ;;  %v1936_v19 = vpop.permute.xlu1 %337 }
  0x9a   :  { %1423 = vmatpush3.bf16.msra.mxu1 %v1604_v10 }
  0x9b   :  { %1424 = vmatprep.subr.bf16.mxu1 %v1605_v26 }
  0x9e   :  { %1425 = vmatpush3.bf16.msra.mxu1 %v1606_v27 }
  0x9f   :  { %1426 = vmatprep.subr.bf16.mxu1 %v1607_v36 }
  0xa2   :  { %1427 = vmatpush3.bf16.msra.mxu1 %v1608_v39 }
  0xa3   :  { %1087 = vmatprep.subr.bf16.mxu1 %v1667_v8 }
 0x148   :  { %v321_v12 = vpop.f32.mrf.mxu0 }
 0x149   :  { %v322_v16 = vadd.f32 %v1342_v13, %v321_v12 }
 0x14a   :  { %v323_v14 = vpop.f32.mrf.mxu0 }
 0x14b   :  { %v352_v24 = vmul.f32 %v1936_v19, %v322_v16 }
 0x14c   :  { %v324_v17 = vpop.f32.mrf.mxu0 }
 0x14d   :  { %v325_v20 = vadd.f32 %v1342_v13, %v324_v17  ;;  %v1949_v34 = vmax.f32 %v352_v24, 0.0 }
 0x14e   :  { %v326_v22 = vpop.f32.mrf.mxu0 }
 0x14f   :  { %v353_v23 = vmul.f32 %v1934_v18, %v325_v20  ;;  %v396_v47 = vrot.slane %v1949_v34, 2  ;;  %v384_v48 = vrot.slane %v1949_v34, 1  ;;  %v372_v61 = vrot.slane %v1949_v34, 7 }
 0x150   :  { %v329_v25 = vpop.f32.mrf.mxu0  ;;  %v360_v36 = vrot.slane %v1949_v34, 6 }
 0x151   :  { %v330_v28 = vadd.f32 %v1342_v13, %v329_v25  ;;  %v1946_v30 = vmax.f32 %v353_v23, 0.0 }
 0x152   :  { %v331_v31 = vpop.f32.mrf.mxu0 }
 0x153   :  { %v354_v32 = vmul.f32 %v1929_v11, %v330_v28  ;;  %v397_v42 = vrot.slane %v1946_v30, 2  ;;  %v385_v43 = vrot.slane %v1946_v30, 1  ;;  %v373_v52 = vrot.slane %v1946_v30, 7 }
 0x154   :  { %v332_v35 = vpop.f32.mrf.mxu0 }
 0x155   :  { %v1954_v37 = vmax.f32 %v354_v32, 0.0  ;;  %v333_v38 = vadd.f32 %v1342_v13, %v332_v35  ;;  %v402_v53 = vsel %vm108_vm6, %v396_v47, %v397_v42  ;;  %v390_v55 = vsel %vm83_vm1, %v384_v48, %v385_v43 }
 0x156   :  { %v334_v41 = vpop.f32.mrf.mxu0  ;;  %v378_v17 = vsel %vm58_vm0, %v372_v61, %v373_v52 }
 0x157   :  { %v355_v44 = vmul.f32 %v1959_v40, %v333_v38  ;;  %v398_v45 = vrot.slane %v1954_v37, 2  ;;  %v386_v46 = vrot.slane %v1954_v37, 1  ;;  %v374_v63 = vrot.slane %v1954_v37, 7 }
 0x158   :  { %v361_v41 = vrot.slane %v1946_v30, 6 }
 0x159   :  { %v1969_v49 = vmax.f32 %v355_v44, 0.0  ;;  %v401_v50 = vsel %vm108_vm6, %v397_v42, %v398_v45  ;;  %v389_v51 = vsel %vm83_vm1, %v385_v43, %v386_v46  ;;  %v377_v24 = vsel %vm58_vm0, %v373_v52, %v374_v63 }
 0x15a   :  { %v405_v54 = vsel %vm114_vm7, %v401_v50, 0.0  ;;  %v393_v56 = vsel %vm89_vm3, %v389_v51, 0.0  ;;  %v382_v26 = vsel %vm65_vm4, %v377_v24, 0.0  ;;  %vm1178_vm7 = vcmask 1041409  }
 0x15b   :  { %v399_v57 = vrot.slane %v1969_v49, 2  ;;  %v450_v58 = vpack.c.bf16 %v405_v54, %v402_v53  ;;  %v1539_v59 = vpack.i.bf16 %v393_v56, %v390_v55  ;;  %v387_v60 = vrot.slane %v1969_v49, 1 }
 0x15c   :  { %v375_v62 = vrot.slane %v1969_v49, 7  ;;  %v363_v31 = vrot.slane %v1969_v49, 6 }
 0x15d   :  { %v403_v4 = vsel %vm108_vm6, %v399_v57, %v396_v47  ;;  %1467 = vmatprep.mubr.msk.bf16.mxu0 %vm182_vm13, %v450_v58  ;;  %1540 = vrot.lane.b32.xlu1 %v1539_v59, %s1670_s29  ;;  %v400_v5 = vsel %vm108_vm6, %v398_v45, %v399_v57  ;;  %v388_v6 = vsel %vm83_vm1, %v386_v46, %v387_v60  ;;  %v362_v46 = vrot.slane %v1954_v37, 6 }
 0x15e   :  { %v407_v10 = vsel %vm116_vm9, %v403_v4, 0.0  ;;  %v391_v12 = vsel %vm83_vm1, %v387_v60, %v384_v48  ;;  %v379_v13 = vsel %vm58_vm0, %v375_v62, %v372_v61  ;;  %v376_v25 = vsel %vm58_vm0, %v374_v63, %v375_v62 }
 0x15f   :  { %v453_v14 = vpack.c.bf16 %v407_v10, %v400_v5  ;;  %v395_v16 = vsel %vm91_vm5, %v391_v12, 0.0  ;;  %v380_v20 = vsel %vm63_vm2, %v379_v13, 0.0  ;;  %v1554_v27 = vpack.i.bf16 %v376_v25, %v382_v26  ;;  %v1609_v5 = vld [vmem:[%s2241_s1 + $0x118] sm:$0xff]   ;;  %v1611_v10 = vld [vmem:[%s2241_s1 + $0x108] sm:$0xff]  }
 0x160   :  { %v1549_v22 = vpack.i.bf16 %v395_v16, %v388_v6  ;;  %v1544_v23 = vpack.i.bf16 %v378_v17, %v380_v20  ;;  %v367_v43 = vsel %vm33_vm10, %v363_v31, %v360_v36  ;;  %v365_v61 = vsel %vm33_vm10, %v361_v41, %v362_v46  ;;  %v1610_v6 = vld [vmem:[%s2241_s1 + $0x110] sm:$0xff]   ;;  %1471 = vmatprep.subr.bf16.mxu0 %v1609_v5  ;;  %v1355_v16 = vld [vmem:[%s2242_s2 + $0x1] ss:$0 sm:$0xff] }
 0x161   :  { %1468 = vmatmul.mubr.msk.bf16.vlgmr.msra.gmra.mxu0 %vm182_vm13, %v453_v14  ;;  %v368_v52 = vsel %vm38_vm11, %v367_v43, 0.0  ;;  %v364_v62 = vsel %vm33_vm10, %v362_v46, %v363_v31  ;;  %v370_v63 = vsel %vm40_vm12, %v365_v61, 0.0  ;;  %vm1673_vm9 = vmmov 0  }
 0x162   :  { %1550 = vrot.lane.b32.xlu1 %v1549_v22, %s1670_s29  ;;  %1545 = vrot.lane.b32.xlu0 %v1544_v23, %s1670_s29 }
 0x163   :  { %1472 = vmatpush3.bf16.msra.mxu0 %v1609_v5 }
 0x164   :  { %1473 = vmatprep.subr.bf16.mxu0 %v1610_v6 }
 0x166   :  { %1555 = vrot.lane.b32.xlu0 %v1554_v27, %s1670_s29 }
 0x167   :  { %1474 = vmatpush3.bf16.msra.mxu0 %v1610_v6 }
 0x168   :  { %1475 = vmatprep.subr.bf16.mxu0 %v1611_v10 }
 0x16b   :  { %1476 = vmatpush3.bf16.msra.mxu0 %v1611_v10 }
 0x1cf   :  { %v1541_v28 = vpop.permute.xlu1 %1540 }
 0x1d0   :  { %v1543_v32 = vunpack.i.h.bf16 %v1541_v28  ;;  %v1542_v35 = vunpack.i.l.bf16 %v1541_v28  ;;  %v1612_v28 = vld [vmem:[%s2241_s1 + $0x100] sm:$0xff]  }
 0x1d1   :  { %1477 = vmatprep.subr.bf16.mxu0 %v1612_v28 }
 0x1d2   :  { %v444_v38 = vsel %vm182_vm13, %v1949_v34, %v1542_v35  ;;  %v445_v39 = vsel %vm182_vm13, %v1946_v30, %v1543_v32  ;;  %v366_v34 = vsel %vm33_vm10, %v360_v36, %v361_v41  ;;  %v1613_v35 = vld [vmem:[%s2241_s1 + $0xf8] sm:$0xff]   ;;  %1478 = vmatpush3.bf16.msra.mxu0 %v1612_v28  ;;  %vm1315_vm10 = vcmask 25600  }
 0x1d3   :  { %v449_v42 = vpack.c.bf16 %v445_v39, %v444_v38  ;;  %1479 = vmatprep.subr.bf16.mxu0 %v1613_v35 }
 0x1d4   :  { %v1551_v44 = vpop.permute.xlu1 %1550  ;;  %v1546_v45 = vpop.permute.xlu0 %1545 }
 0x1d5   :  { %v1553_v47 = vunpack.i.h.bf16 %v1551_v44  ;;  %v1552_v48 = vunpack.i.l.bf16 %v1551_v44  ;;  %v1548_v50 = vunpack.i.h.bf16 %v1546_v45  ;;  %v1547_v51 = vunpack.i.l.bf16 %v1546_v45  ;;  %657 = vmatprep.mubr.bf16.mxu1 %v449_v42 }
 0x1d6   :  { %1480 = vmatpush3.bf16.msra.mxu0 %v1613_v35 }
 0x1d7   :  { %v440_v30 = vsel %vm182_vm13, %v368_v52, %v1547_v51  ;;  %v441_v53 = vsel %vm182_vm13, %v366_v34, %v1548_v50  ;;  %v446_v54 = vsel %vm182_vm13, %v1954_v37, %v1552_v48  ;;  %v447_v55 = vsel %vm182_vm13, %v1969_v49, %v1553_v47  ;;  %v1614_v34 = vld [vmem:[%s2241_s1 + $0xf0] sm:$0xff]  }
 0x1d8   :  { %v1556_v56 = vpop.permute.xlu0 %1555  ;;  %v448_v57 = vpack.c.bf16 %v441_v53, %v440_v30  ;;  %v452_v58 = vpack.c.bf16 %v447_v55, %v446_v54  ;;  %1481 = vmatprep.subr.bf16.mxu0 %v1614_v34 }
 0x1d9   :  { %v1558_v59 = vunpack.i.h.bf16 %v1556_v56  ;;  %v1557_v60 = vunpack.i.l.bf16 %v1556_v56 }
 0x1da   :  { %658 = vmatmul.mubr.bf16.vlgmr.msra.gmra.mxu1 %v448_v57  ;;  %1482 = vmatpush3.bf16.msra.mxu0 %v1614_v34 }
 0x1db   :  { %665 = vmatprep.mubr.bf16.mxu1 %v452_v58  ;;  %v442_v37 = vsel %vm182_vm13, %v370_v63, %v1557_v60  ;;  %v443_v49 = vsel %vm182_vm13, %v364_v62, %v1558_v59 }
 0x1dc   :  { %v451_v4 = vpack.c.bf16 %v443_v49, %v442_v37 }
 0x1e2   :  { %666 = vmatmul.mubr.bf16.gmra.mxu1 %v451_v4 }
 0x221   :  { %v1469_v12 = vpop.f32.mrf.mxu0 }
 0x223   :  { %v708_v14 = vpop.f32.mrf.mxu0 }
 0x225   :  { %v1470_v24 = vpop.f32.mrf.mxu0 }
 0x227   :  { %v711_v36 = vpop.f32.mrf.mxu0 }
 0x29a   :  { %v1428_v13 = vpop.f32.mrf.mxu1 }
 0x29c   :  { %v1429_v17 = vpop.f32.mrf.mxu1 }
 0x29d   :  { %v1430_v20 = vadd.f32 %v1429_v17, %v1428_v13 }
 0x29e   :  { %v1431_v22 = vpop.f32.mrf.mxu1 }
 0x29f   :  { %v660_v23 = vadd.f32 %v1430_v20, %v1355_v16 }
 0x2a0   :  { %v1432_v25 = vpop.f32.mrf.mxu1 }
 0x2a1   :  { %v709_v26 = vadd.f32 %v708_v14, %v660_v23  ;;  %v1433_v27 = vadd.f32 %v1432_v25, %v1431_v22 }
 0x2a2   :  { %v1434_v31 = vpop.f32.mrf.mxu1 }
 0x2a3   :  { %v663_v32 = vadd.f32 %v1433_v27, %v1355_v16  ;;  %v723_v42 = vmul.f32 %v709_v26, %v1936_v19 }
 0x2a4   :  { %v1435_v38 = vpop.f32.mrf.mxu1 }
 0x2a5   :  { %v712_v39 = vadd.f32 %v711_v36, %v663_v32  ;;  %v1436_v41 = vadd.f32 %v1435_v38, %v1434_v31  ;;  %v727_v50 = vmax.f32 %v723_v42, 0.0 }
 0x2a6   :  { %v1437_v43 = vpop.f32.mrf.mxu1 }
 0x2a7   :  { %v668_v44 = vadd.f32 %v1436_v41, %v1355_v16  ;;  %v724_v45 = vmul.f32 %v712_v39, %v1934_v18 }
 0x2a8   :  { %v1438_v46 = vpop.f32.mrf.mxu1 }
 0x2a9   :  { %v717_v47 = vadd.f32 %v1469_v12, %v668_v44  ;;  %v1439_v48 = vadd.f32 %v1438_v46, %v1437_v43  ;;  %v728_v51 = vmax.f32 %v724_v45, 0.0 }
 0x2ab   :  { %v671_v52 = vadd.f32 %v1439_v48, %v1355_v16  ;;  %v1559_v30 = vpack.i.bf16 %v728_v51, %v727_v50  ;;  %v725_v54 = vmul.f32 %v717_v47, %v1929_v11 }
 0x2ad   :  { %v720_v53 = vadd.f32 %v1470_v24, %v671_v52  ;;  %1560 = vrot.lane.b32.xlu1 %v1559_v30, %s1668_s25  ;;  %v729_v56 = vmax.f32 %v725_v54, 0.0 }
 0x2af   :  { %v726_v55 = vmul.f32 %v720_v53, %v1959_v40 }
 0x2b1   :  { %v730_v57 = vmax.f32 %v726_v55, 0.0  ;;  %v1615_v55 = vld [vmem:[%s2241_s1 + $0x158] sm:$0xff]  }
 0x2b2   :  { %1088 = vmatpush1.bf16.msra.mxu1 %v1615_v55 }
 0x2b3   :  { %v1564_v58 = vpack.i.bf16 %v730_v57, %v729_v56  ;;  %v1616_v56 = vld [vmem:[%s2241_s1 + $0x150] sm:$0xff]   ;;  %1089 = vmatprep.subr.bf16.mxu1 %v1667_v8  ;;  %v1617_v57 = vld [vmem:[%s2241_s1 + $0x148] sm:$0xff]  }
 0x2b5   :  { %1565 = vrot.lane.b32.xlu0 %v1564_v58, %s1668_s25  ;;  %v1618_v58 = vld [vmem:[%s2241_s1 + $0x140] sm:$0xff]  }
 0x2b6   :  { %1090 = vmatpush1.bf16.msra.mxu1 %v1616_v56 }
 0x2b7   :  { %1091 = vmatprep.subr.bf16.mxu1 %v1667_v8 }
 0x2ba   :  { %1092 = vmatpush1.bf16.msra.mxu1 %v1617_v57 }
 0x2bb   :  { %1093 = vmatprep.subr.bf16.mxu1 %v1667_v8 }
 0x2be   :  { %1094 = vmatpush1.bf16.msra.mxu1 %v1618_v58 }
 0x2bf   :  { %1095 = vmatprep.subr.bf16.mxu1 %v1667_v8 }
 0x31f   :  { %v1561_v59 = vpop.permute.xlu1 %1560 }
 0x320   :  { %v1563_v60 = vunpack.i.h.bf16 %v1561_v59  ;;  %v1562_v61 = vunpack.i.l.bf16 %v1561_v59  ;;  %v1619_v59 = vld [vmem:[%s2241_s1 + $0x138] sm:$0xff]  }
 0x321   :  { %1096 = vmatpush1.bf16.msra.mxu1 %v1619_v59 }
 0x322   :  { %v748_v62 = vsel %vm177_vm8, %v1703_v1, %v1563_v60  ;;  %v747_v63 = vsel %vm177_vm8, %v1698_v0, %v1562_v61  ;;  %v1378_v0 = vld [vmem:[%s2242_s2 + $0x2] ss:$0 sm:$0xff]  ;;  %v1620_v60 = vld [vmem:[%s2241_s1 + $0x130] sm:$0xff]   ;;  %1097 = vmatprep.subr.bf16.mxu1 %v1667_v8  ;;  %v1621_v61 = vld [vmem:[%s2241_s1 + $0x128] sm:$0xff]  }
 0x323   :  { %v751_v37 = vpack.c.bf16 %v748_v62, %v747_v63  ;;  %v1622_v62 = vld [vmem:[%s2241_s1 + $0x120] sm:$0xff]   ;;  %v1623_v63 = vld [vmem:[%s2241_s1 + $0x178] sm:$0xff]  }
 0x325   :  { %1483 = vmatprep.mubr.msk.bf16.mxu0 %vm187_vm14, %v751_v37  ;;  %1098 = vmatpush1.bf16.msra.mxu1 %v1620_v60  ;;  %v1624_v37 = vld [vmem:[%s2241_s1 + $0x170] sm:$0xff]  }
 0x326   :  { %1099 = vmatprep.subr.bf16.mxu1 %v1667_v8 }
 0x327   :  { %v1566_v49 = vpop.permute.xlu0 %1565 }
 0x328   :  { %v1568_v4 = vunpack.i.h.bf16 %v1566_v49  ;;  %v1567_v5 = vunpack.i.l.bf16 %v1566_v49  ;;  %v1625_v49 = vld [vmem:[%s2241_s1 + $0x168] sm:$0xff]  }
 0x329   :  { %1100 = vmatpush1.bf16.msra.mxu1 %v1621_v61 }
 0x32a   :  { %v750_v6 = vsel %vm177_vm8, %v1708_v2, %v1568_v4  ;;  %v749_v10 = vsel %vm177_vm8, %v1716_v7, %v1567_v5  ;;  %1101 = vmatprep.subr.bf16.mxu1 %v1667_v8  ;;  %vm1181_vm8 = vcmask 517120  }
 0x32b   :  { %v752_v12 = vpack.c.bf16 %v750_v6, %v749_v10 }
 0x32d   :  { %1484 = vmatmul.mubr.msk.bf16.vlgmr.msra.gmra.mxu0 %vm187_vm14, %v752_v12  ;;  %1102 = vmatpush1.bf16.msra.mxu1 %v1622_v62 }
 0x32e   :  { %1111 = vmatprep.subr.bf16.mxu1 %v1667_v8 }
 0x331   :  { %1112 = vmatpush2.bf16.msra.mxu1 %v1623_v63 }
 0x332   :  { %1113 = vmatprep.subr.bf16.mxu1 %v1667_v8 }
 0x335   :  { %1114 = vmatpush2.bf16.msra.mxu1 %v1624_v37 }
 0x336   :  { %1115 = vmatprep.subr.bf16.mxu1 %v1667_v8 }
 0x339   :  { %1116 = vmatpush2.bf16.msra.mxu1 %v1625_v49 }
 0x33a   :  { %1117 = vmatprep.subr.bf16.mxu1 %v1667_v8 }
 0x3ed   :  { %v1485_v13 = vpop.f32.mrf.mxu0 }
 0x3ee   :  { %v855_v17 = vadd.f32 %v1485_v13, %v1378_v0 }
 0x3ef   :  { %v846_v1 = vpop.f32.mrf.mxu0 }
 0x3f0   :  { %v847_v14 = vadd.f32 %v1378_v0, %v846_v1  ;;  %v863_v25 = vmul.f32 %v855_v17, %v1929_v11 }
 0x3f1   :  { %v1486_v16 = vpop.f32.mrf.mxu0 }
 0x3f2   :  { %v861_v20 = vmul.f32 %v847_v14, %v1936_v19  ;;  %v858_v22 = vadd.f32 %v1486_v16, %v1378_v0  ;;  %v867_v19 = vmax.f32 %v863_v25, 0.0 }
 0x3f3   :  { %v849_v23 = vpop.f32.mrf.mxu0 }
 0x3f4   :  { %v864_v2 = vmul.f32 %v858_v22, %v1959_v40  ;;  %v850_v24 = vadd.f32 %v1378_v0, %v849_v23  ;;  %v865_v7 = vmax.f32 %v861_v20, 0.0  ;;  %v875_v40 = vsel %vm182_vm13, %v867_v19, 0.0 }
 0x3f6   :  { %v862_v26 = vmul.f32 %v850_v24, %v1934_v18  ;;  %v869_v27 = vsel %vm182_vm13, %v865_v7, 0.0  ;;  %v868_v28 = vmax.f32 %v864_v2, 0.0  ;;  %v1387_v24 = vld [vmem:[%s2242_s2 + $0x4] ss:$0 sm:$0xff] }
 0x3f7   :  { %870 = vadd.xlane.f32.xlu1 %v869_v27 }
 0x3f8   :  { %v866_v31 = vmax.f32 %v862_v26, 0.0  ;;  %v878_v35 = vsel %vm182_vm13, %v868_v28, 0.0 }
 0x3fa   :  { %v872_v32 = vsel %vm182_vm13, %v866_v31, 0.0 }
 0x3fb   :  { %873 = vadd.xlane.f32.xlu0 %v872_v32  ;;  %879 = vadd.xlane.f32.xlu1 %v878_v35 }
 0x3ff   :  { %876 = vadd.xlane.f32.xlu0 %v875_v40 }
 0x480   :  { %v871_v36 = vpop.xlane.xlu1 %870 }
 0x481   :  { %v882_v38 = vmul.f32 0.015625, %v871_v36 }
 0x483   :  { %v2095_v11 = vsub.f32 %v865_v7, %v882_v38 }
 0x484   :  { %v874_v18 = vpop.xlane.xlu0 %873  ;;  %v880_v39 = vpop.xlane.xlu1 %879 }
 0x485   :  { %v883_v41 = vmul.f32 0.015625, %v874_v18  ;;  %v885_v42 = vmul.f32 0.015625, %v880_v39  ;;  %v890_v43 = vmul.f32 %v2095_v11, %v2095_v11 }
 0x487   :  { %v2099_v44 = vsub.f32 %v866_v31, %v883_v41  ;;  %v2101_v45 = vsub.f32 %v868_v28, %v885_v42  ;;  %v894_v46 = vsel %vm182_vm13, %v890_v43, 0.0  ;;  %v1388_v28 = vld [vmem:[%s2242_s2 + $0x5] ss:$0 sm:$0xff] }
 0x488   :  { %v877_v47 = vpop.xlane.xlu0 %876  ;;  %895 = vadd.xlane.f32.xlu0 %v894_v46 }
 0x489   :  { %v884_v48 = vmul.f32 0.015625, %v877_v47  ;;  %v891_v50 = vmul.f32 %v2099_v44, %v2099_v44  ;;  %v893_v52 = vmul.f32 %v2101_v45, %v2101_v45 }
 0x48b   :  { %v2106_v51 = vsub.f32 %v867_v19, %v884_v48  ;;  %v897_v34 = vsel %vm182_vm13, %v891_v50, 0.0  ;;  %v903_v54 = vsel %vm182_vm13, %v893_v52, 0.0  ;;  %v1626_v19 = vld [vmem:[%s2241_s1 + $0x160] sm:$0xff]  }
 0x48c   :  { %898 = vadd.xlane.f32.xlu1 %v897_v34  ;;  %1118 = vmatpush2.bf16.msra.mxu1 %v1626_v19 }
 0x48d   :  { %v892_v30 = vmul.f32 %v2106_v51, %v2106_v51 }
 0x48f   :  { %v900_v53 = vsel %vm182_vm13, %v892_v30, 0.0 }
 0x490   :  { %901 = vadd.xlane.f32.xlu0 %v900_v53  ;;  %904 = vadd.xlane.f32.xlu1 %v903_v54 }
 0x511   :  { %v896_v4 = vpop.xlane.xlu0 %895 }
 0x512   :  { %v906_v5 = vmul.f32 0.015625, %v896_v4 }
 0x514   :  { %v910_v6 = vadd.f32 1e-05, %v906_v5 }
 0x515   :  { %v899_v10 = vpop.xlane.xlu1 %898 }
 0x516   :  { %1631 = vrsqrt.f32 %v910_v6  ;;  %v907_v12 = vmul.f32 0.015625, %v899_v10 }
 0x518   :  { %v911_v13 = vadd.f32 1e-05, %v907_v12 }
 0x519   :  { %v902_v0 = vpop.xlane.xlu0 %901  ;;  %v905_v1 = vpop.xlane.xlu1 %904 }
 0x51a   :  { %1633 = vrsqrt.f32 %v911_v13  ;;  %v908_v14 = vmul.f32 0.015625, %v902_v0  ;;  %v909_v16 = vmul.f32 0.015625, %v905_v1  ;;  %v1141_v13 = vand.u32 127, %v20_v3  ;;  %v1389_v0 = vld [vmem:[%s2242_s2 + $0x3] ss:$0 sm:$0xff] }
 0x51c   :  { %v912_v17 = vadd.f32 1e-05, %v908_v14  ;;  %v913_v20 = vadd.f32 1e-05, %v909_v16  ;;  %vm1143_vm15 = vcmp.lt.s32.totalorder %v1141_v13, 32  ;;  %vm1146_vm0 = vcmp.ge.s32.totalorder %v1141_v13, 32 }
 0x51d   :  { %v1145_v1 = vsel %vm1143_vm15, 15, %v1667_v8 }
 0x51e   :  { %1635 = vrsqrt.f32 %v912_v17 }
 0x51f   :  { %1637 = vrsqrt.f32 %v913_v20 }
 0x523   :  { %v1632_v22 = vpop.eup %1631 }
 0x524   :  { %v918_v23 = vmul.f32 %v1632_v22, %v2095_v11 }
 0x526   :  { %v927_v25 = vmul.f32 %v1387_v24, %v918_v23 }
 0x527   :  { %v1634_v2 = vpop.eup %1633 }
 0x528   :  { %v919_v7 = vmul.f32 %v1634_v2, %v2099_v44  ;;  %v936_v38 = vadd.f32 %v1388_v28, %v927_v25 }
 0x52a   :  { %v928_v26 = vmul.f32 %v1387_v24, %v919_v7  ;;  %v948_v43 = vrot.slane %v936_v38, 2  ;;  %v940_v46 = vrot.slane %v936_v38, 1 }
 0x52b   :  { %v1636_v27 = vpop.eup %1635 }
 0x52c   :  { %v1638_v31 = vpop.eup %1637  ;;  %v920_v32 = vmul.f32 %v1636_v27, %v2106_v51  ;;  %v937_v35 = vadd.f32 %v1388_v28, %v928_v26 }
 0x52d   :  { %v921_v40 = vmul.f32 %v1638_v31, %v2101_v45 }
 0x52e   :  { %v929_v36 = vmul.f32 %v1387_v24, %v920_v32  ;;  %v949_v39 = vrot.slane %v937_v35, 2  ;;  %v941_v41 = vrot.slane %v937_v35, 1 }
 0x52f   :  { %v930_v11 = vmul.f32 %v1387_v24, %v921_v40 }
 0x530   :  { %v938_v18 = vadd.f32 %v1388_v28, %v929_v36  ;;  %v954_v45 = vsel %vm108_vm6, %v948_v43, %v949_v39  ;;  %v946_v52 = vsel %vm83_vm1, %v940_v46, %v941_v41 }
 0x531   :  { %v939_v42 = vadd.f32 %v1388_v28, %v930_v11 }
 0x532   :  { %v950_v44 = vrot.slane %v938_v18, 2  ;;  %v942_v47 = vrot.slane %v938_v18, 1 }
 0x533   :  { %v943_v48 = vrot.slane %v939_v42, 1  ;;  %v951_v50 = vrot.slane %v939_v42, 2 }
 0x534   :  { %v953_v51 = vsel %vm108_vm6, %v949_v39, %v950_v44  ;;  %v945_v34 = vsel %vm83_vm1, %v941_v41, %v942_v47 }
 0x535   :  { %v977_v30 = vpack.c.bf16 %v953_v51, %v954_v45  ;;  %v1569_v53 = vpack.i.bf16 %v945_v34, %v946_v52  ;;  %v944_v54 = vsel %vm83_vm1, %v942_v47, %v943_v48  ;;  %v947_v55 = vsel %vm83_vm1, %v943_v48, %v940_v46 }
 0x536   :  { %v1574_v56 = vpack.i.bf16 %v947_v55, %v944_v54  ;;  %v952_v57 = vsel %vm108_vm6, %v950_v44, %v951_v50  ;;  %v955_v58 = vsel %vm108_vm6, %v951_v50, %v948_v43  ;;  %vm1147_vm1 = vcmp.lt.s32.totalorder %v1141_v13, 64 }
 0x537   :  { %1402 = vmatprep.mubr.msk.bf16.mxu1 %vm182_vm13, %v977_v30  ;;  %1570 = vrot.lane.b32.xlu0 %v1569_v53, %s1670_s29  ;;  %v979_v59 = vpack.c.bf16 %v955_v58, %v952_v57  ;;  %vm1148_vm2 = vmand %vm1146_vm0, %vm1147_vm1 }
 0x538   :  { %1575 = vrot.lane.b32.xlu1 %v1574_v56, %s1670_s29  ;;  %v1149_v17 = vsel %vm1148_vm2, 14, %v1145_v1  ;;  %v1405_v1 = vld [vmem:[%s2242_s2 + $0x7] ss:$0 sm:$0xff] }
 0x539   :  { %vm1150_vm3 = vcmp.lt.s32.totalorder %v1730_v15, %v1149_v17  ;;  %vm1151_vm4 = vcmp.lt.s32.totalorder %v1745_v21, %v1149_v17  ;;  %vm1152_vm5 = vcmp.lt.s32.totalorder %v1759_v29, %v1149_v17  ;;  %vm1153_vm6 = vcmp.lt.s32.totalorder %v1767_v33, %v1149_v17 }
 0x5a9   :  { %v1571_v60 = vpop.permute.xlu0 %1570 }
 0x5aa   :  { %v1573_v61 = vunpack.i.h.bf16 %v1571_v60  ;;  %v1572_v62 = vunpack.i.l.bf16 %v1571_v60  ;;  %v1576_v63 = vpop.permute.xlu1 %1575 }
 0x5ab   :  { %v1578_v5 = vunpack.i.h.bf16 %v1576_v63  ;;  %v1577_v6 = vunpack.i.l.bf16 %v1576_v63  ;;  %v1672_v63 = vmov 0.0  }
 0x5ac   :  { %v973_v37 = vsel %vm182_vm13, %v937_v35, %v1573_v61  ;;  %v972_v49 = vsel %vm182_vm13, %v936_v38, %v1572_v62  ;;  %v1627_v62 = vld [vmem:[%s2241_s1 + $0x198] sm:$0xff]   ;;  %1487 = vmatprep.subr.bf16.mxu0 %v1672_v63  ;;  %1495 = vmatprep.mubr.msk.bf16.mxu0 %vm1673_vm9, %v1672_v63 }
 0x5ad   :  { %v976_v4 = vpack.c.bf16 %v973_v37, %v972_v49  ;;  %v974_v9 = vsel %vm182_vm13, %v938_v18, %v1577_v6  ;;  %v975_v10 = vsel %vm182_vm13, %v939_v42, %v1578_v5  ;;  %1488 = vmatpush3.bf16.msra.mxu0 %v1627_v62  ;;  %v1628_v37 = vld [vmem:[%s2241_s1 + $0x190] sm:$0xff]   ;;  %v1629_v49 = vld [vmem:[%s2241_s1 + $0x188] sm:$0xff]  }
 0x5ae   :  { %v978_v12 = vpack.c.bf16 %v975_v10, %v974_v9  ;;  %1489 = vmatprep.subr.bf16.mxu0 %v1672_v63 }
 0x5af   :  { %1120 = vmatmul.mubr.bf16.vlgmr.msra.gmra.mxu1 %v976_v4  ;;  %v1630_v4 = vld [vmem:[%s2241_s1 + $0x180] sm:$0xff]  }
 0x5b0   :  { %1403 = vmatprep.mubr.msk.bf16.mxu1 %vm182_vm13, %v979_v59 }
 0x5b1   :  { %1490 = vmatpush3.bf16.msra.mxu0 %v1628_v37 }
 0x5b2   :  { %1491 = vmatprep.subr.bf16.mxu0 %v1672_v63 }
 0x5b5   :  { %1492 = vmatpush3.bf16.msra.mxu0 %v1629_v49 }
 0x5b6   :  { %1493 = vmatprep.subr.bf16.mxu0 %v1672_v63 }
 0x5b7   :  { %1128 = vmatmul.mubr.bf16.gmra.mxu1 %v978_v12  ;;  %v1404_v12 = vld [vmem:[%s2242_s2 + $0x6] ss:$0 sm:$0xff] }
 0x5b9   :  { %1494 = vmatpush3.bf16.msra.mxu0 %v1630_v4 }
 0x66f   :  { %v1121_v14 = vpop.f32.mrf.mxu1 }
 0x670   :  { %v1122_v16 = vadd.f32 %v1389_v0, %v1121_v14 }
 0x671   :  { %v1123_v20 = vpop.f32.mrf.mxu1 }
 0x672   :  { %v1136_v22 = vmax.f32 %v1122_v16, 0.0 }
 0x673   :  { %v1124_v23 = vpop.f32.mrf.mxu1 }
 0x674   :  { %v1125_v2 = vadd.f32 %v1389_v0, %v1124_v23  ;;  %v1154_v24 = vsel %vm1150_vm3, %v1136_v22, 0.0 }
 0x675   :  { %v1126_v3 = vpop.f32.mrf.mxu1  ;;  %v1158_v8 = vsel %vm182_vm13, %v1154_v24, -inf }
 0x676   :  { %v1137_v7 = vmax.f32 %v1125_v2, 0.0 }
 0x677   :  { %v1129_v25 = vpop.f32.mrf.mxu1 }
 0x678   :  { %v1155_v26 = vsel %vm1151_vm4, %v1137_v7, 0.0  ;;  %v1130_v27 = vadd.f32 %v1389_v0, %v1129_v25 }
 0x679   :  { %v1159_v28 = vsel %vm182_vm13, %v1155_v26, -inf  ;;  %v1131_v31 = vpop.f32.mrf.mxu1 }
 0x67a   :  { %v1160_v32 = vmax.f32 %v1158_v8, %v1159_v28  ;;  %v1138_v35 = vmax.f32 %v1130_v27, 0.0  ;;  %v1411_v27 = vld [vmem:[%s2242_s2 + $0x8] ss:$0 sm:$0xff]  ;;  %s1674_s2 = smov [#allocation2]  }
 0x67b   :  { %v1132_v15 = vpop.f32.mrf.mxu1  ;;  %s1334_s9 = sshll.u32 %s1674_s2, 4  ;;  %s1335_s9 = int_to_ptr.vmem [resolvable:$true] %s1334_s9 }
 0x67c   :  { %v1161_v19 = vrot.slane %v1160_v32, 4  ;;  %v1133_v40 = vadd.f32 %v1389_v0, %v1132_v15  ;;  %v1156_v38 = vsel %vm1152_vm5, %v1138_v35, 0.0  ;;  %s1645_s10 = scalar_lea.vmem %s1335_s9, 32  ;;  %p1650_p1 = scmp.lt.s32.totalorder %s1335_s9, %s1335_s9 }
 0x67d   :  { %v1134_v21 = vpop.f32.mrf.mxu1  ;;  %v1167_v39 = vsel %vm182_vm13, %v1156_v38, -inf  ;;  %p1646_p0 = scmp.ne.s32.totalorder %s1335_s9, %s1645_s10  ;;  %p1651_p2 = scmp.lt.s32.totalorder %s1645_s10, %s1645_s10 }
 0x67e   :  { %v1162_v36 = vmax.f32 %v1160_v32, %v1161_v19  ;;  %v1139_v11 = vmax.f32 %v1133_v40, 0.0 }
 0x67f   :  { %p1652_p3 = por %p1651_p2, %p1650_p1 }
 0x680   :  { %v1157_v18 = vsel %vm1153_vm6, %v1139_v11, 0.0  ;;  %v1163_v42 = vrot.slane %v1162_v36, 2 }
 0x681   :  { %v1168_v41 = vsel %vm182_vm13, %v1157_v18, -inf  ;;  %p1653_p4 = pnand %p1652_p3, %p1646_p0 }
 0x682   :  { %v1169_v43 = vmax.f32 %v1167_v39, %v1168_v41  ;;  %v1164_v47 = vmax.f32 %v1162_v36, %v1163_v42 }
 0x684   :  { %v1170_v44 = vrot.slane %v1169_v43, 4  ;;  %v1165_v48 = vrot.slane %v1164_v47, 1 }
 0x686   :  { %v1171_v46 = vmax.f32 %v1169_v43, %v1170_v44  ;;  %v1166_v33 = vmax.f32 %v1164_v47, %v1165_v48 }
 0x688   :  { %v1172_v29 = vrot.slane %v1171_v46, 2 }
 0x68a   :  { %v1173_v50 = vmax.f32 %v1171_v46, %v1172_v29 }
 0x68c   :  { %v1174_v51 = vrot.slane %v1173_v50, 1 }
 0x68e   :  { %v1175_v45 = vmax.f32 %v1173_v50, %v1174_v51 }
 0x690   :  { %v1179_v34 = vsel %vm1178_vm7, %v1175_v45, %v1166_v33 }
 0x691   :  { %v1182_v52 = vsel %vm1181_vm8, %v1179_v34, 0.0 }
 0x692   :  { %1183 = vadd.xlane.f32.xlu1 %v1182_v52 }
 0x71b   :  { %v1184_v30 = vpop.xlane.xlu1 %1183 }
 0x71c   :  { %v1185_v53 = vmul.f32 0.015625, %v1184_v30 }
 0x71e   :  { %v1187_v54 = vrot.slane %v1185_v53, 1  ;;  %v1190_v55 = vsub.f32 %v1166_v33, %v1185_v53 }
 0x720   :  { %v1191_v56 = vsub.f32 %v1175_v45, %v1187_v54  ;;  %v1192_v58 = vmul.f32 %v1190_v55, %v1190_v55 }
 0x722   :  { %v1193_v57 = vmul.f32 %v1191_v56, %v1191_v56 }
 0x724   :  { %v1196_v59 = vrot.slane %v1193_v57, 7 }
 0x726   :  { %v1197_v60 = vsel %vm1178_vm7, %v1196_v59, %v1192_v58 }
 0x727   :  { %v1199_v61 = vsel %vm1181_vm8, %v1197_v60, 0.0 }
 0x728   :  { %1200 = vadd.xlane.f32.xlu0 %v1199_v61 }
 0x7b1   :  { %v1201_v5 = vpop.xlane.xlu0 %1200 }
 0x7b2   :  { %v1202_v6 = vmul.f32 0.015625, %v1201_v5 }
 0x7b4   :  { %v1203_v9 = vadd.f32 1e-05, %v1202_v6 }
 0x7b6   :  { %1639 = vrsqrt.f32 %v1203_v9 }
 0x7c3   :  { %v1640_v10 = vpop.eup %1639 }
 0x7c4   :  { %v1206_v13 = vrot.slane %v1640_v10, 1  ;;  %v1209_v0 = vmul.f32 %v1640_v10, %v1190_v55 }
 0x7c6   :  { %v1210_v14 = vmul.f32 %v1206_v13, %v1191_v56  ;;  %v1216_v16 = vmul.f32 %v1404_v12, %v1209_v0 }
 0x7c8   :  { %v1217_v17 = vmul.f32 %v1404_v12, %v1210_v14  ;;  %v1223_v20 = vadd.f32 %v1405_v1, %v1216_v16 }
 0x7ca   :  { %v1224_v22 = vadd.f32 %v1405_v1, %v1217_v17  ;;  %v1225_v23 = vpack.c.bf16 %v1223_v20, %v1223_v20 }
 0x7cc   :  { %v1226_v2 = vpack.c.bf16 %v1224_v22, %v1224_v22  ;;  %v1237_v24 = vunpack.c.l.b16 %v1225_v23 }
 0x7ce   :  { %v1238_v3 = vunpack.c.l.b16 %v1226_v2 }
 0x7d0   :  { %v1239_v7 = vrot.slane %v1238_v3, 7 }
 0x7d2   :  { %v1240_v25 = vsel %vm1178_vm7, %v1239_v7, %v1237_v24 }
 0x7d3   :  { %v1241_v26 = vpack.c.b16 %v1240_v25, %v1240_v25 }
 0x7d5   :  { %1496 = vmatmul.mubr.msk.bf16.vlgmr.msra.gmra.mxu0 %vm182_vm13, %v1241_v26 }
 0x895   :  { %v1303_v8 = vpop.f32.mrf.mxu0 }
 0x896   :  { %v1314_v28 = vadd.f32 %v1411_v27, %v1303_v8 }
 0x897   :  { %v1497_v31 = vpop.f32.mrf.mxu0 }
 0x898   :  { %v1316_v32 = vsel %vm1315_vm10, %v1314_v28, -inf }
 0x899   :  { %1317 = vmax.xlane.f32.xlu0 %v1316_v32  ;;  %v1306_v35 = vpop.f32.mrf.mxu0 }
 0x89b   :  { %v1498_v15 = vpop.f32.mrf.mxu0 }
 0x922   :  { %v1318_v19 = vpop.xlane.xlu0 %1317 }
 0x923   :  { %v1319_v40 = vsub.f32 %v1314_v28, %v1318_v19 }
 0x925   :  { %v1320_v21 = vmul.f32 1.442695, %v1319_v40 }
 0x927   :  { %1641 = vpow2.f32 %v1320_v21 }
 0x934   :  { %v1642_v36 = vpop.eup %1641 }
 0x935   :  { %v1322_v38 = vsel %vm1315_vm10, %v1642_v36, 0.0 }
 0x936   :  { %1323 = vadd.xlane.f32.xlu1 %v1322_v38 }
 0x9bf   :  { %v1324_v11 = vpop.xlane.xlu1 %1323 }
 0x9c0   :  { %1643 = vrcp.f32 %v1324_v11 }
 0x9cd   :  { %v1644_v18 = vpop.eup %1643 }
 0x9ce   :  { %v1326_v39 = vmul.f32 %v1644_v18, %v1642_v36 }
 0x9d0   :  { %1327 = vst.msk [vmem:[#allocation2] sm:$0x3] %vm1315_vm10, %v1326_v39 }
 0x9d1   :  { %1656 = shalt.err (!%p1653_p4)
}
 0x9d2   :  { %1337 = dma.vmem_to_hbm [thread:$0]  %s1335_s9, 32, %s2243_s3, [#allocation3]  }
 0x9d3   :  { %1665 = dma.done.wait [#allocation3], 32  }
 0x9d4   :  { %1666 = vsyncadd [#allocation3], 4294967264 }
 0x9d5   :  { %1341 = vsyncpa [#allocation3], 1 }

</bundles_post_ra>
